<compile_context>
chip_gen: v7x
topology: tpu7x:2x2x1
jax: 0.10.0
libtpu: 0.0.40
codegen_flags: <defaults>
</compile_context>

<pallas_src>
import functools

import jax
import jax.numpy as jnp
from jax.experimental import pallas as pl
from jax.experimental.pallas import tpu as pltpu

_EPS = 1e-5


# ---------------------------------------------------------------------------
# Tiling
# ---------------------------------------------------------------------------
def _pick_row_tile(M, cap=256):
    """Largest multiple-of-8 divisor of M that is <= min(cap, M // 2), so the
    row grid has >= 2 steps (keeps both v7x TensorCores busy) and per-step VMEM
    stays small.  Falls back to a single full-M block (always legal)."""
    best = None
    upper = min(cap, M // 2)
    t = 8
    while t <= upper:
        if M % t == 0:
            best = t
        t += 8
    return best if best is not None else M


# ---------------------------------------------------------------------------
# Fused GEMM kernel:
#   out = act( relu(x*scale + shift) @ W + b )
#   plus optional per-column sum / sum-of-squares of the pre-activation result
#   (row 0 / row 1 of an 8-row stats block per row tile).
# ---------------------------------------------------------------------------
def _fused_gemm_kernel(*refs, fuse_bn_relu, activation, emit_stats):
    if fuse_bn_relu:
        x_ref, s_ref, t_ref, w_ref, b_ref = refs[:5]
        rest = refs[5:]
        x = jnp.maximum(x_ref[...] * s_ref[...] + t_ref[...], 0.0)
    else:
        x_ref, w_ref, b_ref = refs[:3]
        rest = refs[3:]
        x = x_ref[...]

    if emit_stats:
        o_ref, st_ref = rest
    else:
        (o_ref,) = rest

    # bf16 operands on the MXU, f32 accumulation.
    y = jnp.dot(x.astype(jnp.bfloat16), w_ref[...],
                preferred_element_type=jnp.float32) + b_ref[...]

    if emit_stats:
        cs = jnp.sum(y, axis=0, keepdims=True)          # (1, N) column sums
        css = jnp.sum(y * y, axis=0, keepdims=True)     # (1, N) column sumsq
        rows_idx = jax.lax.broadcasted_iota(jnp.int32, (8, y.shape[1]), 0)
        st_ref[...] = jnp.where(rows_idx == 0, cs,
                                jnp.where(rows_idx == 1, css, 0.0))

    if activation == "tanh":
        y = jnp.tanh(y)
    o_ref[...] = y.astype(o_ref.dtype)


def fused_gemm(x, w, b_cols, scale=None, shift=None, activation=None,
               emit_stats=False):
    """(M,K)f32 @ (K,N)bf16 + b, with optional fused BN-affine+ReLU prologue
    (per-input-column scale/shift), optional tanh epilogue and optional
    per-column sum / sum-of-squares outputs (for BN batch statistics)."""
    M, K = x.shape
    K2, N = w.shape
    assert K == K2 and b_cols.shape == (N,)
    fuse = scale is not None

    if M < 8:
        # Perf review: at tiny batch the layer-1 GEMM has < 8 rows (sub-sublane
        # masked stores) and ~1 MFLOP; a pallas_call launch costs more than the
        # GEMM itself, so leave it to plain XLA.
        xx = x
        if fuse:
            xx = jnp.maximum(xx * scale[None, :] + shift[None, :], 0.0)
        y = jnp.dot(xx.astype(jnp.bfloat16), w,
                    preferred_element_type=jnp.float32) + b_cols[None, :]
        cs, css = jnp.sum(y, axis=0), jnp.sum(y * y, axis=0)
        if activation == "tanh":
            y = jnp.tanh(y)
        return (y, cs, css) if emit_stats else y

    tm = _pick_row_tile(M)
    grid_m = M // tm

    kernel = functools.partial(_fused_gemm_kernel, fuse_bn_relu=fuse,
                               activation=activation, emit_stats=emit_stats)

    in_specs = [pl.BlockSpec((tm, K), lambda i: (i, 0))]
    args = [x]
    if fuse:
        in_specs += [pl.BlockSpec((1, K), lambda i: (0, 0)),
                     pl.BlockSpec((1, K), lambda i: (0, 0))]
        args += [scale.reshape(1, K).astype(jnp.float32),
                 shift.reshape(1, K).astype(jnp.float32)]
    # Constant index maps: W and bias are fetched once and stay VMEM-resident
    # (no per-row-tile re-read of the weights).
    in_specs += [pl.BlockSpec((K, N), lambda i: (0, 0)),
                 pl.BlockSpec((1, N), lambda i: (0, 0))]
    args += [w, b_cols.reshape(1, N).astype(jnp.float32)]

    out_shapes = [jax.ShapeDtypeStruct((M, N), jnp.float32)]
    out_specs = [pl.BlockSpec((tm, N), lambda i: (i, 0))]
    if emit_stats:
        # Per-row-tile partial stats so the row grid can stay "parallel";
        # reduced over tiles (tiny array) in the wrapper.
        out_shapes.append(jax.ShapeDtypeStruct((8 * grid_m, N), jnp.float32))
        out_specs.append(pl.BlockSpec((8, N), lambda i: (i, 0)))

    outs = pl.pallas_call(
        kernel,
        out_shape=tuple(out_shapes),
        grid=(grid_m,),
        in_specs=in_specs,
        out_specs=tuple(out_specs),
        compiler_params=pltpu.CompilerParams(
            dimension_semantics=("parallel",)),
    )(*args)

    if emit_stats:
        y, st = outs
        st = st.reshape(grid_m, 8, N)
        return y, jnp.sum(st[:, 0, :], axis=0), jnp.sum(st[:, 1, :], axis=0)
    return outs[0] if isinstance(outs, (tuple, list)) else outs


# ---------------------------------------------------------------------------
# BatchNorm affine from the GEMM-emitted per-column statistics
# ---------------------------------------------------------------------------
def _bn_affine(colsum, colsumsq, rows, kk, gamma, beta):
    """BatchNorm2d training-mode scale/shift from per-column (kh,kw,co) sums.
    `rows` = number of GEMM rows, `kk` = number of kernel positions."""
    C = gamma.shape[0]
    n = rows * kk
    s = colsum.reshape(kk, C).sum(axis=0)
    ss = colsumsq.reshape(kk, C).sum(axis=0)
    mean = s / n
    var = ss / n - mean * mean           # biased variance (PyTorch fwd)
    scale = gamma * jax.lax.rsqrt(var + _EPS)
    shift = beta - mean * scale
    return scale, shift


# ---------------------------------------------------------------------------
# Generator forward (Pallas path)
# ---------------------------------------------------------------------------
def generator_forward(x_nchw, pp):
    """Input (B, 128, 1, 1) NCHW  ->  output (B, 3, 32, 32) NCHW."""
    B = x_nchw.shape[0]
    x = x_nchw.reshape(B, 128).astype(jnp.float32)

    # Layer 1: ConvTranspose2d(128, 256, 4, 1, 0) on a 1x1 input == one GEMM.
    y1, s1, q1 = fused_gemm(x, pp["w1"], pp["bc1"], emit_stats=True)
    sc1, sh1 = _bn_affine(s1, q1, rows=B, kk=16, gamma=pp["g1"], beta=pp["be1"])
    r1 = y1.reshape(B * 16, 256)          # pure reshape; rows (n,kh1,kw1)

    # Layer 2: [BN1+ReLU prologue] ConvTranspose2d(256, 128, 2, 2, 0)
    y2, s2, q2 = fused_gemm(r1, pp["w2"], pp["bc2"], sc1, sh1, emit_stats=True)
    sc2, sh2 = _bn_affine(s2, q2, rows=B * 16, kk=4, gamma=pp["g2"], beta=pp["be2"])
    r2 = y2.reshape(B * 64, 128)          # rows (n,kh1,kw1,kh2,kw2)

    # Layer 3: [BN2+ReLU prologue] ConvTranspose2d(128, 64, 2, 2, 0)
    y3, s3, q3 = fused_gemm(r2, pp["w3"], pp["bc3"], sc2, sh2, emit_stats=True)
    sc3, sh3 = _bn_affine(s3, q3, rows=B * 64, kk=4, gamma=pp["g3"], beta=pp["be3"])

    # Layer 4: [BN3+ReLU prologue] ConvTranspose2d(64, 3, 2, 2, 0) + Tanh, as a
    # block-diagonal GEMM over the un-scattered (B*64, 4*64) layer-3 rows:
    # K=256 contraction depth, 128 lane-dense output columns (48 real).
    y4 = fused_gemm(y3, pp["w4bd"], pp["bc4bd"],
                    jnp.tile(sc3, 4), jnp.tile(sh3, 4), activation="tanh")
    y4 = y4[:, :48]                       # cols (kh3,kw3,kh4,kw4,c)

    # Un-shuffle the bit-interleaved spatial order into a 32x32 NCHW image.
    # (The only transpose in the whole forward; tiny output tensor.)
    img = y4.reshape(B, 4, 4, 2, 2, 2, 2, 2, 2, 3)
    img = img.transpose(0, 9, 1, 3, 5, 7, 2, 4, 6, 8)
    return img.reshape(B, 3, 32, 32)


# ---------------------------------------------------------------------------
# Pure-JAX f32 reference with the same (exact) ConvTranspose -> GEMM math
# ---------------------------------------------------------------------------
def generator_reference(x_nchw, p):
    B = x_nchw.shape[0]

    def bn_relu(rows, gamma, beta):
        mean = rows.mean(axis=0)
        var = rows.var(axis=0)
        scale = gamma / jnp.sqrt(var + _EPS)
        return jnp.maximum(rows * scale + (beta - mean * scale), 0.0)

    y1 = x_nchw.reshape(B, 128) @ p["w1"] + p["bc1"]
    a1 = bn_relu(y1.reshape(B * 16, 256), p["g1"], p["be1"])
    y2 = a1 @ p["w2"] + p["bc2"]
    a2 = bn_relu(y2.reshape(B * 64, 128), p["g2"], p["be2"])
    y3 = a2 @ p["w3"] + p["bc3"]
    a3 = bn_relu(y3.reshape(B * 256, 64), p["g3"], p["be3"])
    y4 = jnp.tanh(a3 @ p["w4"] + p["bc4"])          # (B*256, 12)
    img = y4.reshape(B, 4, 4, 2, 2, 2, 2, 2, 2, 3)
    img = img.transpose(0, 9, 1, 3, 5, 7, 2, 4, 6, 8)
    return img.reshape(B, 3, 32, 32)


# ---------------------------------------------------------------------------
# Parameters (shapes from nn.ConvTranspose2d / nn.BatchNorm2d)
# ---------------------------------------------------------------------------
def init_params(key):
    ks = jax.random.split(key, 14)

    def conv_w(k, cin, cout, ksz):
        # PyTorch ConvTranspose2d weight: (Cin, Cout, KH, KW).  GEMM columns in
        # (kh, kw, co) order so the inter-layer "scatter" is a pure reshape.
        w = jax.random.normal(k, (cin, cout, ksz, ksz), jnp.float32) * 0.05
        return w.transpose(0, 2, 3, 1).reshape(cin, ksz * ksz * cout)

    def conv_b(k, cout, ksz):
        b = jax.random.normal(k, (cout,), jnp.float32) * 0.05
        return jnp.tile(b, ksz * ksz)    # per-column bias = b[co], cols (kh,kw,co)

    return {
        "w1": conv_w(ks[0], 128, 256, 4), "bc1": conv_b(ks[1], 256, 4),
        "w2": conv_w(ks[2], 256, 128, 2), "bc2": conv_b(ks[3], 128, 2),
        "w3": conv_w(ks[4], 128, 64, 2),  "bc3": conv_b(ks[5], 64, 2),
        "w4": conv_w(ks[6], 64, 3, 2),    "bc4": conv_b(ks[7], 3, 2),
        "g1": 1.0 + 0.1 * jax.random.normal(ks[8], (256,), jnp.float32),
        "be1": 0.1 * jax.random.normal(ks[9], (256,), jnp.float32),
        "g2": 1.0 + 0.1 * jax.random.normal(ks[10], (128,), jnp.float32),
        "be2": 0.1 * jax.random.normal(ks[11], (128,), jnp.float32),
        "g3": 1.0 + 0.1 * jax.random.normal(ks[12], (64,), jnp.float32),
        "be3": 0.1 * jax.random.normal(ks[13], (64,), jnp.float32),
    }


def prepare_pallas_params(p):
    """One-time weight prep: bf16 cast, block-diag + lane-dense pad for layer 4."""
    pp = {
        "w1": p["w1"].astype(jnp.bfloat16), "bc1": p["bc1"],
        "w2": p["w2"].astype(jnp.bfloat16), "bc2": p["bc2"],
        "w3": p["w3"].astype(jnp.bfloat16), "bc3": p["bc3"],
        "g1": p["g1"], "be1": p["be1"],
        "g2": p["g2"], "be2": p["be2"],
        "g3": p["g3"], "be3": p["be3"],
    }
    # Layer 4 as a block-diagonal GEMM over the 4 (kh3,kw3) positions of the
    # un-scattered layer-3 output: (256 -> 48), zero-padded to 128 columns so
    # stores are lane-dense and the MXU sees K=256 instead of K=64.
    w4, b4 = p["w4"], p["bc4"]                           # (64, 12), (12,)
    w4bd = jnp.zeros((256, 48), jnp.float32)
    for pos in range(4):
        w4bd = w4bd.at[pos * 64:(pos + 1) * 64,
                       pos * 12:(pos + 1) * 12].set(w4)
    pp["w4bd"] = jnp.pad(w4bd, ((0, 0), (0, 80))).astype(jnp.bfloat16)
    pp["bc4bd"] = jnp.pad(jnp.tile(b4, 4), (0, 80)).astype(jnp.float32)
    return pp


if __name__ == "__main__":
    key = jax.random.PRNGKey(0)
    kp, kx = jax.random.split(key)
    params = init_params(kp)
    pallas_params = prepare_pallas_params(params)

    # DCGAN generator latent: (N, 128, 1, 1), NCHW like PyTorch.
    B = 2
    x = jax.random.normal(kx, (B, 128, 1, 1), jnp.float32)

    fwd = jax.jit(generator_forward)
    out = jax.block_until_ready(fwd(x, pallas_params))
    assert out.shape == (B, 3, 32, 32), out.shape

    ref = generator_reference(x, params)                 # pure f32 reference
    max_err = float(jnp.max(jnp.abs(out - ref)))
    assert jnp.allclose(out, ref, atol=4e-2, rtol=4e-2), max_err

    print("KERNEL_OK")
</pallas_src>

<mosaic_0001>
module attributes {stable_mosaic.version = 11 : i64} {
  func.func @_fused_gemm_kernel(%arg0: i32, %arg1: memref<16x256xf32, #tpu.memory_space<vmem>>, %arg2: memref<1x256xf32, #tpu.memory_space<vmem>>, %arg3: memref<1x256xf32, #tpu.memory_space<vmem>>, %arg4: memref<256x512xbf16, #tpu.memory_space<vmem>>, %arg5: memref<1x512xf32, #tpu.memory_space<vmem>>, %arg6: memref<16x512xf32, #tpu.memory_space<vmem>>, %arg7: memref<8x512xf32, #tpu.memory_space<vmem>>) attributes {dimension_semantics = [#tpu.dimension_semantics<parallel>], iteration_bounds = array<i64: 2>, scalar_prefetch = 0 : i64, scratch_operands = 0 : i64, tpu.core_type = #tpu.core_type<tc>, window_params = [{transform_indices = @transform_0, window_bounds = array<i64: 16, 256>}, {pipeline_mode = #tpu.pipeline_mode<synchronous>, transform_indices = @transform_1, window_bounds = array<i64: 1, 256>}, {pipeline_mode = #tpu.pipeline_mode<synchronous>, transform_indices = @transform_2, window_bounds = array<i64: 1, 256>}, {pipeline_mode = #tpu.pipeline_mode<synchronous>, transform_indices = @transform_3, window_bounds = array<i64: 256, 512>}, {pipeline_mode = #tpu.pipeline_mode<synchronous>, transform_indices = @transform_4, window_bounds = array<i64: 1, 512>}, {transform_indices = @transform_5, window_bounds = array<i64: 16, 512>}, {transform_indices = @transform_6, window_bounds = array<i64: 8, 512>}]} {
    %c0 = arith.constant 0 : index
    %c0_0 = arith.constant 0 : index
    %0 = vector.load %arg1[%c0, %c0_0] : memref<16x256xf32, #tpu.memory_space<vmem>>, vector<16x256xf32>
    %c0_1 = arith.constant 0 : index
    %c0_2 = arith.constant 0 : index
    %1 = vector.load %arg2[%c0_1, %c0_2] : memref<1x256xf32, #tpu.memory_space<vmem>>, vector<1x256xf32>
    %2 = vector.broadcast %1 : vector<1x256xf32> to vector<16x256xf32>
    %3 = arith.mulf %0, %2 : vector<16x256xf32>
    %c0_3 = arith.constant 0 : index
    %c0_4 = arith.constant 0 : index
    %4 = vector.load %arg3[%c0_3, %c0_4] : memref<1x256xf32, #tpu.memory_space<vmem>>, vector<1x256xf32>
    %5 = vector.broadcast %4 : vector<1x256xf32> to vector<16x256xf32>
    %6 = arith.addf %3, %5 : vector<16x256xf32>
    %cst = arith.constant 0.000000e+00 : f32
    %7 = vector.broadcast %cst : f32 to vector<16x256xf32>
    %8 = arith.maximumf %6, %7 : vector<16x256xf32>
    %9 = arith.truncf %8 : vector<16x256xf32> to vector<16x256xbf16>
    %c0_5 = arith.constant 0 : index
    %c0_6 = arith.constant 0 : index
    %10 = vector.load %arg4[%c0_5, %c0_6] : memref<256x512xbf16, #tpu.memory_space<vmem>>, vector<256x512xbf16>
    %cst_7 = arith.constant dense<0.000000e+00> : vector<16x512xf32>
    %11 = tpu.matmul %9, %10, %cst_7 {dimension_numbers = #tpu.dot_dimension_numbers<[1], [0], [0], [1], [0, 0, 1, 1], [], []>} : vector<16x256xbf16>, vector<256x512xbf16>, vector<16x512xf32> -> vector<16x512xf32>
    %c0_8 = arith.constant 0 : index
    %c0_9 = arith.constant 0 : index
    %12 = vector.load %arg5[%c0_8, %c0_9] : memref<1x512xf32, #tpu.memory_space<vmem>>, vector<1x512xf32>
    %13 = vector.broadcast %12 : vector<1x512xf32> to vector<16x512xf32>
    %14 = arith.addf %11, %13 : vector<16x512xf32>
    %cst_10 = arith.constant dense<0.000000e+00> : vector<512xf32>
    %15 = vector.multi_reduction <add>, %14, %cst_10 [0] : vector<16x512xf32> to vector<512xf32>
    %16 = vector.shape_cast %15 : vector<512xf32> to vector<1x512xf32>
    %17 = arith.mulf %14, %14 : vector<16x512xf32>
    %cst_11 = arith.constant dense<0.000000e+00> : vector<512xf32>
    %18 = vector.multi_reduction <add>, %17, %cst_11 [0] : vector<16x512xf32> to vector<512xf32>
    %19 = vector.shape_cast %18 : vector<512xf32> to vector<1x512xf32>
    %20 = tpu.iota {dimensions = array<i32: 0>} : vector<8x512xi32>
    %c0_i32 = arith.constant 0 : i32
    %21 = vector.broadcast %c0_i32 : i32 to vector<8x512xi32>
    %22 = arith.cmpi eq, %20, %21 : vector<8x512xi32>
    %c1_i32 = arith.constant 1 : i32
    %23 = vector.broadcast %c1_i32 : i32 to vector<8x512xi32>
    %24 = arith.cmpi eq, %20, %23 : vector<8x512xi32>
    %cst_12 = arith.constant 0.000000e+00 : f32
    %25 = vector.shape_cast %19 : vector<1x512xf32> to vector<1x512xf32>
    %26 = vector.broadcast %25 : vector<1x512xf32> to vector<8x512xf32>
    %27 = vector.broadcast %cst_12 : f32 to vector<8x512xf32>
    %28 = arith.select %24, %26, %27 : vector<8x512xi1>, vector<8x512xf32>
    %29 = vector.shape_cast %16 : vector<1x512xf32> to vector<1x512xf32>
    %30 = vector.broadcast %29 : vector<1x512xf32> to vector<8x512xf32>
    %31 = arith.select %22, %30, %28 : vector<8x512xi1>, vector<8x512xf32>
    %c0_13 = arith.constant 0 : index
    %c0_14 = arith.constant 0 : index
    %32 = vector.load %arg7[%c0_13, %c0_14] : memref<8x512xf32, #tpu.memory_space<vmem>>, vector<8x512xf32>
    tpu.vector_store %arg7[%c0_13, %c0_14], %31 {strides = array<i32>} : memref<8x512xf32, #tpu.memory_space<vmem>>, vector<8x512xf32>,
    %c0_15 = arith.constant 0 : index
    %c0_16 = arith.constant 0 : index
    %33 = vector.load %arg6[%c0_15, %c0_16] : memref<16x512xf32, #tpu.memory_space<vmem>>, vector<16x512xf32>
    tpu.vector_store %arg6[%c0_15, %c0_16], %14 {strides = array<i32>} : memref<16x512xf32, #tpu.memory_space<vmem>>, vector<16x512xf32>,
    return
  }
  func.func @transform_0(%arg0: i32) -> (i32, i32) {
    %c0_i32 = arith.constant 0 : i32
    %c0_i32_0 = arith.constant 0 : i32
    return %arg0, %c0_i32 : i32, i32
  }
  func.func @transform_1(%arg0: i32) -> (i32, i32) {
    %c0_i32 = arith.constant 0 : i32
    %c0_i32_0 = arith.constant 0 : i32
    %c0_i32_1 = arith.constant 0 : i32
    return %c0_i32, %c0_i32_0 : i32, i32
  }
  func.func @transform_2(%arg0: i32) -> (i32, i32) {
    %c0_i32 = arith.constant 0 : i32
    %c0_i32_0 = arith.constant 0 : i32
    %c0_i32_1 = arith.constant 0 : i32
    return %c0_i32, %c0_i32_0 : i32, i32
  }
  func.func @transform_3(%arg0: i32) -> (i32, i32) {
    %c0_i32 = arith.constant 0 : i32
    %c0_i32_0 = arith.constant 0 : i32
    %c0_i32_1 = arith.constant 0 : i32
    return %c0_i32, %c0_i32_0 : i32, i32
  }
  func.func @transform_4(%arg0: i32) -> (i32, i32) {
    %c0_i32 = arith.constant 0 : i32
    %c0_i32_0 = arith.constant 0 : i32
    %c0_i32_1 = arith.constant 0 : i32
    return %c0_i32, %c0_i32_0 : i32, i32
  }
  func.func @transform_5(%arg0: i32) -> (i32, i32) {
    %c0_i32 = arith.constant 0 : i32
    %c0_i32_0 = arith.constant 0 : i32
    return %arg0, %c0_i32 : i32, i32
  }
  func.func @transform_6(%arg0: i32) -> (i32, i32) {
    %c0_i32 = arith.constant 0 : i32
    %c0_i32_0 = arith.constant 0 : i32
    return %arg0, %c0_i32 : i32, i32
  }
}

module attributes {stable_mosaic.version = 11 : i64} {
  func.func @_fused_gemm_kernel(%arg0: i32, %arg1: memref<64x128xf32, #tpu.memory_space<vmem>>, %arg2: memref<1x128xf32, #tpu.memory_space<vmem>>, %arg3: memref<1x128xf32, #tpu.memory_space<vmem>>, %arg4: memref<128x256xbf16, #tpu.memory_space<vmem>>, %arg5: memref<1x256xf32, #tpu.memory_space<vmem>>, %arg6: memref<64x256xf32, #tpu.memory_space<vmem>>, %arg7: memref<8x256xf32, #tpu.memory_space<vmem>>) attributes {dimension_semantics = [#tpu.dimension_semantics<parallel>], iteration_bounds = array<i64: 2>, scalar_prefetch = 0 : i64, scratch_operands = 0 : i64, tpu.core_type = #tpu.core_type<tc>, window_params = [{transform_indices = @transform_0, window_bounds = array<i64: 64, 128>}, {pipeline_mode = #tpu.pipeline_mode<synchronous>, transform_indices = @transform_1, window_bounds = array<i64: 1, 128>}, {pipeline_mode = #tpu.pipeline_mode<synchronous>, transform_indices = @transform_2, window_bounds = array<i64: 1, 128>}, {pipeline_mode = #tpu.pipeline_mode<synchronous>, transform_indices = @transform_3, window_bounds = array<i64: 128, 256>}, {pipeline_mode = #tpu.pipeline_mode<synchronous>, transform_indices = @transform_4, window_bounds = array<i64: 1, 256>}, {transform_indices = @transform_5, window_bounds = array<i64: 64, 256>}, {transform_indices = @transform_6, window_bounds = array<i64: 8, 256>}]} {
    %c0 = arith.constant 0 : index
    %c0_0 = arith.constant 0 : index
    %0 = vector.load %arg1[%c0, %c0_0] : memref<64x128xf32, #tpu.memory_space<vmem>>, vector<64x128xf32>
    %c0_1 = arith.constant 0 : index
    %c0_2 = arith.constant 0 : index
    %1 = vector.load %arg2[%c0_1, %c0_2] : memref<1x128xf32, #tpu.memory_space<vmem>>, vector<1x128xf32>
    %2 = vector.broadcast %1 : vector<1x128xf32> to vector<64x128xf32>
    %3 = arith.mulf %0, %2 : vector<64x128xf32>
    %c0_3 = arith.constant 0 : index
    %c0_4 = arith.constant 0 : index
    %4 = vector.load %arg3[%c0_3, %c0_4] : memref<1x128xf32, #tpu.memory_space<vmem>>, vector<1x128xf32>
    %5 = vector.broadcast %4 : vector<1x128xf32> to vector<64x128xf32>
    %6 = arith.addf %3, %5 : vector<64x128xf32>
    %cst = arith.constant 0.000000e+00 : f32
    %7 = vector.broadcast %cst : f32 to vector<64x128xf32>
    %8 = arith.maximumf %6, %7 : vector<64x128xf32>
    %9 = arith.truncf %8 : vector<64x128xf32> to vector<64x128xbf16>
    %c0_5 = arith.constant 0 : index
    %c0_6 = arith.constant 0 : index
    %10 = vector.load %arg4[%c0_5, %c0_6] : memref<128x256xbf16, #tpu.memory_space<vmem>>, vector<128x256xbf16>
    %cst_7 = arith.constant dense<0.000000e+00> : vector<64x256xf32>
    %11 = tpu.matmul %9, %10, %cst_7 {dimension_numbers = #tpu.dot_dimension_numbers<[1], [0], [0], [1], [0, 0, 1, 1], [], []>} : vector<64x128xbf16>, vector<128x256xbf16>, vector<64x256xf32> -> vector<64x256xf32>
    %c0_8 = arith.constant 0 : index
    %c0_9 = arith.constant 0 : index
    %12 = vector.load %arg5[%c0_8, %c0_9] : memref<1x256xf32, #tpu.memory_space<vmem>>, vector<1x256xf32>
    %13 = vector.broadcast %12 : vector<1x256xf32> to vector<64x256xf32>
    %14 = arith.addf %11, %13 : vector<64x256xf32>
    %cst_10 = arith.constant dense<0.000000e+00> : vector<256xf32>
    %15 = vector.multi_reduction <add>, %14, %cst_10 [0] : vector<64x256xf32> to vector<256xf32>
    %16 = vector.shape_cast %15 : vector<256xf32> to vector<1x256xf32>
    %17 = arith.mulf %14, %14 : vector<64x256xf32>
    %cst_11 = arith.constant dense<0.000000e+00> : vector<256xf32>
    %18 = vector.multi_reduction <add>, %17, %cst_11 [0] : vector<64x256xf32> to vector<256xf32>
    %19 = vector.shape_cast %18 : vector<256xf32> to vector<1x256xf32>
    %20 = tpu.iota {dimensions = array<i32: 0>} : vector<8x256xi32>
    %c0_i32 = arith.constant 0 : i32
    %21 = vector.broadcast %c0_i32 : i32 to vector<8x256xi32>
    %22 = arith.cmpi eq, %20, %21 : vector<8x256xi32>
    %c1_i32 = arith.constant 1 : i32
    %23 = vector.broadcast %c1_i32 : i32 to vector<8x256xi32>
    %24 = arith.cmpi eq, %20, %23 : vector<8x256xi32>
    %cst_12 = arith.constant 0.000000e+00 : f32
    %25 = vector.shape_cast %19 : vector<1x256xf32> to vector<1x256xf32>
    %26 = vector.broadcast %25 : vector<1x256xf32> to vector<8x256xf32>
    %27 = vector.broadcast %cst_12 : f32 to vector<8x256xf32>
    %28 = arith.select %24, %26, %27 : vector<8x256xi1>, vector<8x256xf32>
    %29 = vector.shape_cast %16 : vector<1x256xf32> to vector<1x256xf32>
    %30 = vector.broadcast %29 : vector<1x256xf32> to vector<8x256xf32>
    %31 = arith.select %22, %30, %28 : vector<8x256xi1>, vector<8x256xf32>
    %c0_13 = arith.constant 0 : index
    %c0_14 = arith.constant 0 : index
    %32 = vector.load %arg7[%c0_13, %c0_14] : memref<8x256xf32, #tpu.memory_space<vmem>>, vector<8x256xf32>
    tpu.vector_store %arg7[%c0_13, %c0_14], %31 {strides = array<i32>} : memref<8x256xf32, #tpu.memory_space<vmem>>, vector<8x256xf32>,
    %c0_15 = arith.constant 0 : index
    %c0_16 = arith.constant 0 : index
    %33 = vector.load %arg6[%c0_15, %c0_16] : memref<64x256xf32, #tpu.memory_space<vmem>>, vector<64x256xf32>
    tpu.vector_store %arg6[%c0_15, %c0_16], %14 {strides = array<i32>} : memref<64x256xf32, #tpu.memory_space<vmem>>, vector<64x256xf32>,
    return
  }
  func.func @transform_0(%arg0: i32) -> (i32, i32) {
    %c0_i32 = arith.constant 0 : i32
    %c0_i32_0 = arith.constant 0 : i32
    return %arg0, %c0_i32 : i32, i32
  }
  func.func @transform_1(%arg0: i32) -> (i32, i32) {
    %c0_i32 = arith.constant 0 : i32
    %c0_i32_0 = arith.constant 0 : i32
    %c0_i32_1 = arith.constant 0 : i32
    return %c0_i32, %c0_i32_0 : i32, i32
  }
  func.func @transform_2(%arg0: i32) -> (i32, i32) {
    %c0_i32 = arith.constant 0 : i32
    %c0_i32_0 = arith.constant 0 : i32
    %c0_i32_1 = arith.constant 0 : i32
    return %c0_i32, %c0_i32_0 : i32, i32
  }
  func.func @transform_3(%arg0: i32) -> (i32, i32) {
    %c0_i32 = arith.constant 0 : i32
    %c0_i32_0 = arith.constant 0 : i32
    %c0_i32_1 = arith.constant 0 : i32
    return %c0_i32, %c0_i32_0 : i32, i32
  }
  func.func @transform_4(%arg0: i32) -> (i32, i32) {
    %c0_i32 = arith.constant 0 : i32
    %c0_i32_0 = arith.constant 0 : i32
    %c0_i32_1 = arith.constant 0 : i32
    return %c0_i32, %c0_i32_0 : i32, i32
  }
  func.func @transform_5(%arg0: i32) -> (i32, i32) {
    %c0_i32 = arith.constant 0 : i32
    %c0_i32_0 = arith.constant 0 : i32
    return %arg0, %c0_i32 : i32, i32
  }
  func.func @transform_6(%arg0: i32) -> (i32, i32) {
    %c0_i32 = arith.constant 0 : i32
    %c0_i32_0 = arith.constant 0 : i32
    return %arg0, %c0_i32 : i32, i32
  }
}

module attributes {stable_mosaic.version = 11 : i64} {
  func.func @_fused_gemm_kernel(%arg0: i32, %arg1: memref<64x256xf32, #tpu.memory_space<vmem>>, %arg2: memref<1x256xf32, #tpu.memory_space<vmem>>, %arg3: memref<1x256xf32, #tpu.memory_space<vmem>>, %arg4: memref<256x128xbf16, #tpu.memory_space<vmem>>, %arg5: memref<1x128xf32, #tpu.memory_space<vmem>>, %arg6: memref<64x128xf32, #tpu.memory_space<vmem>>) attributes {dimension_semantics = [#tpu.dimension_semantics<parallel>], iteration_bounds = array<i64: 2>, scalar_prefetch = 0 : i64, scratch_operands = 0 : i64, tpu.core_type = #tpu.core_type<tc>, window_params = [{transform_indices = @transform_0, window_bounds = array<i64: 64, 256>}, {pipeline_mode = #tpu.pipeline_mode<synchronous>, transform_indices = @transform_1, window_bounds = array<i64: 1, 256>}, {pipeline_mode = #tpu.pipeline_mode<synchronous>, transform_indices = @transform_2, window_bounds = array<i64: 1, 256>}, {pipeline_mode = #tpu.pipeline_mode<synchronous>, transform_indices = @transform_3, window_bounds = array<i64: 256, 128>}, {pipeline_mode = #tpu.pipeline_mode<synchronous>, transform_indices = @transform_4, window_bounds = array<i64: 1, 128>}, {transform_indices = @transform_5, window_bounds = array<i64: 64, 128>}]} {
    %c0 = arith.constant 0 : index
    %c0_0 = arith.constant 0 : index
    %0 = vector.load %arg1[%c0, %c0_0] : memref<64x256xf32, #tpu.memory_space<vmem>>, vector<64x256xf32>
    %c0_1 = arith.constant 0 : index
    %c0_2 = arith.constant 0 : index
    %1 = vector.load %arg2[%c0_1, %c0_2] : memref<1x256xf32, #tpu.memory_space<vmem>>, vector<1x256xf32>
    %2 = vector.broadcast %1 : vector<1x256xf32> to vector<64x256xf32>
    %3 = arith.mulf %0, %2 : vector<64x256xf32>
    %c0_3 = arith.constant 0 : index
    %c0_4 = arith.constant 0 : index
    %4 = vector.load %arg3[%c0_3, %c0_4] : memref<1x256xf32, #tpu.memory_space<vmem>>, vector<1x256xf32>
    %5 = vector.broadcast %4 : vector<1x256xf32> to vector<64x256xf32>
    %6 = arith.addf %3, %5 : vector<64x256xf32>
    %cst = arith.constant 0.000000e+00 : f32
    %7 = vector.broadcast %cst : f32 to vector<64x256xf32>
    %8 = arith.maximumf %6, %7 : vector<64x256xf32>
    %9 = arith.truncf %8 : vector<64x256xf32> to vector<64x256xbf16>
    %c0_5 = arith.constant 0 : index
    %c0_6 = arith.constant 0 : index
    %10 = vector.load %arg4[%c0_5, %c0_6] : memref<256x128xbf16, #tpu.memory_space<vmem>>, vector<256x128xbf16>
    %cst_7 = arith.constant dense<0.000000e+00> : vector<64x128xf32>
    %11 = tpu.matmul %9, %10, %cst_7 {dimension_numbers = #tpu.dot_dimension_numbers<[1], [0], [0], [1], [0, 0, 1, 1], [], []>} : vector<64x256xbf16>, vector<256x128xbf16>, vector<64x128xf32> -> vector<64x128xf32>
    %c0_8 = arith.constant 0 : index
    %c0_9 = arith.constant 0 : index
    %12 = vector.load %arg5[%c0_8, %c0_9] : memref<1x128xf32, #tpu.memory_space<vmem>>, vector<1x128xf32>
    %13 = vector.broadcast %12 : vector<1x128xf32> to vector<64x128xf32>
    %14 = arith.addf %11, %13 : vector<64x128xf32>
    %15 = math.tanh %14 : vector<64x128xf32>
    %c0_10 = arith.constant 0 : index
    %c0_11 = arith.constant 0 : index
    %16 = vector.load %arg6[%c0_10, %c0_11] : memref<64x128xf32, #tpu.memory_space<vmem>>, vector<64x128xf32>
    tpu.vector_store %arg6[%c0_10, %c0_11], %15 {strides = array<i32>} : memref<64x128xf32, #tpu.memory_space<vmem>>, vector<64x128xf32>,
    return
  }
  func.func @transform_0(%arg0: i32) -> (i32, i32) {
    %c0_i32 = arith.constant 0 : i32
    %c0_i32_0 = arith.constant 0 : i32
    return %arg0, %c0_i32 : i32, i32
  }
  func.func @transform_1(%arg0: i32) -> (i32, i32) {
    %c0_i32 = arith.constant 0 : i32
    %c0_i32_0 = arith.constant 0 : i32
    %c0_i32_1 = arith.constant 0 : i32
    return %c0_i32, %c0_i32_0 : i32, i32
  }
  func.func @transform_2(%arg0: i32) -> (i32, i32) {
    %c0_i32 = arith.constant 0 : i32
    %c0_i32_0 = arith.constant 0 : i32
    %c0_i32_1 = arith.constant 0 : i32
    return %c0_i32, %c0_i32_0 : i32, i32
  }
  func.func @transform_3(%arg0: i32) -> (i32, i32) {
    %c0_i32 = arith.constant 0 : i32
    %c0_i32_0 = arith.constant 0 : i32
    %c0_i32_1 = arith.constant 0 : i32
    return %c0_i32, %c0_i32_0 : i32, i32
  }
  func.func @transform_4(%arg0: i32) -> (i32, i32) {
    %c0_i32 = arith.constant 0 : i32
    %c0_i32_0 = arith.constant 0 : i32
    %c0_i32_1 = arith.constant 0 : i32
    return %c0_i32, %c0_i32_0 : i32, i32
  }
  func.func @transform_5(%arg0: i32) -> (i32, i32) {
    %c0_i32 = arith.constant 0 : i32
    %c0_i32_0 = arith.constant 0 : i32
    return %arg0, %c0_i32 : i32, i32
  }
}

</mosaic_0001>

<bundles_post_ra>
// kernel: tile.17
= control target key start
LH: loop header
LB: loop body
LE: loop exit
PB: predicated region body
PF: predicated region fallthrough
CT: control target
= control target key end

     0   :  { %s22_s0 = inlined_call_operand.vmem [shape: f32[64], index: 0, kind: input, shape index: {}]   ;;  %s23_s1 = inlined_call_operand.vmem [shape: f32[4,64], index: 1, kind: output, shape index: {}]  }
   0x1   :  { %v4_v0 = vld [vmem:[%s22_s0] ss:$0 sm:$0xff] }
   0x2   :  { %5 = vst [vmem:[%s23_s1] sm:$0xf] %v4_v0 }

// kernel: tile.19
= control target key start
LH: loop header
LB: loop body
LE: loop exit
PB: predicated region body
PF: predicated region fallthrough
CT: control target
= control target key end

     0   :  { %s6_s8 = smov 3  ;;  %vm8_vm0 = vcmask 523264   ;;  %s30_s9 = smov 64   ;;  %vm15_vm1 = vcmask 1048064   ;;  %s50_s0 = inlined_call_operand.vmem [shape: f32[4,64], index: 0, kind: input, shape index: {}]   ;;  %s51_s1 = inlined_call_operand.vmem [shape: f32[1,256], index: 1, kind: output, shape index: {}]  }
   0x1   :  { %v4_v0 = vld [vmem:[%s50_s0] sm:$0xf]  ;;  %s11_s0 = smov 3 }
   0x2   :  { %5 = vst [vmem:[#allocation1] sm:$0xf] %v4_v0 }
   0x9   :  { %v12_v1 = vld [vmem:[#allocation1 + $0x1] ss:$2 sm:%s11_s0]   ;;  %v7_v2 = vld [vmem:[#allocation1] ss:$2 sm:%s6_s8]  }
   0xa   :  { %13 = vrot.lane.b32.xlu0 %v12_v1, %s30_s9  ;;  %9 = vst.msk [vmem:[#allocation0] ss:$8 sm:$0x3] %vm8_vm0, %v7_v2  }
  0x7c   :  { %v14_v3 = vpop.permute.xlu0 %13  }
  0x7d   :  { %16 = vst.msk [vmem:[#allocation0] ss:$8 sm:$0x3] %vm15_vm1, %v14_v3  }
  0x84   :  { %v20_v4 = vld [vmem:[#allocation0] sm:$0x1]  ;;  %v24_v5 = vld [vmem:[#allocation0 + $0x8] sm:$0x1] }
  0x85   :  { %22 = vst [vmem:[%s51_s1] sm:$0x1] %v20_v4  ;;  %28 = vst [vmem:[%s51_s1 + $0x1] sm:$0x1] %v24_v5 }

// kernel: generator_forward.4
= control target key start
LH: loop header
LB: loop body
LE: loop exit
PB: predicated region body
PF: predicated region fallthrough
CT: control target
= control target key end

     0   :  { %s814_s21 = smov 0   ;;  %s948_s0 = inlined_call_operand.vmem [shape: f32[128,128], index: 0, kind: input, shape index: {}]   ;;  %s949_s1 = inlined_call_operand.vmem [shape: f32[1,128], index: 1, kind: input, shape index: {}]   ;;  %s950_s2 = inlined_call_operand.vmem [shape: f32[1,128], index: 2, kind: input, shape index: {}]   ;;  %s951_s3 = inlined_call_operand.vmem [shape: bf16[128,256], index: 3, kind: input, shape index: {}]   ;;  %s952_s4 = inlined_call_operand.vmem [shape: f32[1,256], index: 4, kind: input, shape index: {}]   ;;  %s953_s5 = inlined_call_operand.vmem [shape: f32[128,256], index: 5, kind: output, shape index: {0}]   ;;  %s954_s6 = inlined_call_operand.vmem [shape: f32[16,256], index: 6, kind: output, shape index: {1}]  }
   0x1 LB: > { %s820_s22 = sadd.s32 4294967295, %s776_s21   ;;  %p691_p0 = scmp.ge.s32.totalorder %s776_s21, 1  ;;  %s776_s21 = sphi %s814_s21, %s17_s21  }
   0x2   : > { %p216_p1 = scmp.lt.s32.totalorder %s776_s21, 3 }
   0x4   : > { %p217_p2 = pnand %p691_p0, %p216_p1 }
   0x5   : > { %v746_v0 = vld [vmem:[%s951_s3 + $0x4] ss:$8 sps:$4 sm:$0xff] (!%p217_p2)   ;;  %s692_s25 = sshll.u32 (!%p217_p2), %s820_s22, 3  ;;  %v748_v1 = vld [vmem:[%s951_s3] ss:$8 sps:$4 sm:$0xff] (!%p217_p2)   ;;  %v778_v2 = vmov (!%p217_p2), 0   ;;  %v339_v55 = vlaneseq (!%p217_p2) }
   0x6   : > { %220 = sbr.rel (%p217_p2) target bundleno = 291 (0x123), region = 40  ;;  %461 = vmatprep.mubr.bf16.mxu0 (!%p217_p2), %v778_v2  ;;  %p253_p3 = scmp.lt.s32.totalorder (!%p217_p2), %s692_s25, 15  ;;  %481 = vmatprep.mubr.bf16.mxu1 (!%p217_p2), %v778_v2  ;;  %v749_v3 = vld [vmem:[%s951_s3 + $0x14] ss:$8 sps:$4 sm:$0xff] (!%p217_p2)   ;;  %v751_v4 = vld [vmem:[%s951_s3 + $0x10] ss:$8 sps:$4 sm:$0xff] (!%p217_p2)  }
   0x7   : > { %429 = vmatprep.subr.bf16.mxu0 (!%p217_p2), %v746_v0  ;;  %721 = vmatprep.subr.bf16.mxu1 (!%p217_p2), %v746_v0  ;;  %v752_v5 = vld [vmem:[%s951_s3 + $0x24] ss:$8 sps:$4 sm:$0xff] (!%p217_p2)   ;;  %v754_v6 = vld [vmem:[%s951_s3 + $0x20] ss:$8 sps:$4 sm:$0xff] (!%p217_p2)   ;;  %v755_v7 = vld [vmem:[%s951_s3 + $0x34] ss:$8 sps:$4 sm:$0xff] (!%p217_p2)  }
   0x8   : > { %430 = vmatpush1.bf16.msra.mxu0 (!%p217_p2), %v748_v1  ;;  %729 = vmatpush1.bf16.msra.mxu1 (!%p217_p2), %v748_v1  ;;  %v757_v8 = vld [vmem:[%s951_s3 + $0x30] ss:$8 sps:$4 sm:$0xff] (!%p217_p2)   ;;  %v758_v9 = vld [vmem:[%s951_s3 + $0x44] ss:$8 sps:$4 sm:$0xff] (!%p217_p2)   ;;  %v760_v10 = vld [vmem:[%s951_s3 + $0x40] ss:$8 sps:$4 sm:$0xff] (!%p217_p2)  }
   0x9   : > { %431 = vmatprep.subr.bf16.mxu0 (!%p217_p2), %v749_v3  ;;  %722 = vmatprep.subr.bf16.mxu1 (!%p217_p2), %v749_v3  ;;  %v699_v12 = vld [vmem:[%s949_s1] ss:$0 sm:$0xff] (!%p217_p2)  ;;  %v761_v16 = vld [vmem:[%s951_s3 + $0x54] ss:$8 sps:$4 sm:$0xff] (!%p217_p2)   ;;  %v763_v22 = vld [vmem:[%s951_s3 + $0x50] ss:$8 sps:$4 sm:$0xff] (!%p217_p2)  }
   0xa   : > { %v700_v19 = vld [vmem:[%s950_s2] ss:$0 sm:$0xff] (!%p217_p2)  ;;  %v764_v23 = vld [vmem:[%s951_s3 + $0x64] ss:$8 sps:$4 sm:$0xff] (!%p217_p2)   ;;  %v767_v33 = vld [vmem:[%s951_s3 + $0x74] ss:$8 sps:$4 sm:$0xff] (!%p217_p2)  }
   0xb   : > { %v766_v31 = vld [vmem:[%s951_s3 + $0x60] ss:$8 sps:$4 sm:$0xff] (!%p217_p2)   ;;  %v769_v42 = vld [vmem:[%s951_s3 + $0x70] ss:$8 sps:$4 sm:$0xff] (!%p217_p2)   ;;  %v899_v56 = vshrl.u32 (!%p217_p2), %v339_v55, 7  ;;  %p265_p4 = scmp.lt.s32.totalorder (!%p217_p2), %s820_s22, 1 }
   0xc   : > { %432 = vmatpush1.bf16.msra.mxu0 (!%p217_p2), %v751_v4  ;;  %730 = vmatpush1.bf16.msra.mxu1 (!%p217_p2), %v751_v4  ;;  %v337_v58 = vld [vmem:[%s952_s4] sm:$0x3] (!%p217_p2) }
   0xd   : > { %s956_s25 = smov (!%p253_p3, %s692_s25), 15  ;;  %433 = vmatprep.subr.bf16.mxu0 %v752_v5  ;;  %723 = vmatprep.subr.bf16.mxu1 %v752_v5  ;;  %v341_v57 = vsub.s32 0, %v899_v56  ;;  %v345_v59 = vsub.s32 1, %v899_v56  ;;  %s958_s22 = smov (!%p265_p4, %s820_s22), 1  ;;  %vm573_vm0 = vcmp.eq.s32.totalorder %v899_v56, 1  ;;  %vm572_vm1 = vcmp.eq.s32.totalorder %v899_v56, 0 }
   0xe   : > { %s693_s14 = sshll.u32 %s956_s25, 3  ;;  %s719_s23 = sshll.u32 %s956_s25, 4 }
   0xf   : > { %s857_s19 = scalar_lea.vmem %s948_s0, %s693_s14  ;;  %v342_v60 = vrot.slane %v337_v58, %v341_v57  ;;  %v907_v61 = vrot.slane %v337_v58, %v345_v59  ;;  %s912_s27 = scalar_lea.vmem %s953_s5, %s719_s23 }
  0x10   : > { %434 = vmatpush1.bf16.msra.mxu0 %v754_v6  ;;  %731 = vmatpush1.bf16.msra.mxu1 %v754_v6  ;;  %v271_v11 = vld [vmem:[%s857_s19] sm:$0xff]  ;;  %v272_v13 = vld [vmem:[%s857_s19 + $0x8] sm:$0xff]  ;;  %v273_v28 = vld [vmem:[%s857_s19 + $0x10] sm:$0xff]  ;;  %s720_s25 = sshll.u32 %s958_s22, 4 }
  0x11   : > { %435 = vmatprep.subr.bf16.mxu0 %v755_v7  ;;  %724 = vmatprep.subr.bf16.mxu1 %v755_v7  ;;  %v275_v14 = vld [vmem:[%s857_s19 + $0x20] sm:$0xff]  ;;  %v276_v15 = vld [vmem:[%s857_s19 + $0x28] sm:$0xff]  ;;  %v286_v17 = vmul.f32 %v699_v12, %v271_v11  ;;  %v287_v18 = vmul.f32 %v699_v12, %v272_v13  ;;  %v274_v29 = vld [vmem:[%s857_s19 + $0x18] sm:$0xff]  ;;  %v288_v35 = vmul.f32 %v699_v12, %v273_v28  ;;  %s269_s30 = scalar_lea.vmem %s954_s6, %s720_s25 }
  0x12   : > { %v290_v20 = vmul.f32 %v699_v12, %v275_v14  ;;  %v291_v21 = vmul.f32 %v699_v12, %v276_v15  ;;  %v277_v30 = vld [vmem:[%s857_s19 + $0x30] sm:$0xff]  ;;  %v278_v32 = vld [vmem:[%s857_s19 + $0x38] sm:$0xff]  ;;  %v289_v36 = vmul.f32 %v699_v12, %v274_v29 }
  0x13   : > { %v301_v24 = vadd.f32 %v700_v19, %v286_v17  ;;  %v302_v25 = vadd.f32 %v700_v19, %v287_v18  ;;  %v292_v37 = vmul.f32 %v699_v12, %v277_v30  ;;  %v293_v41 = vmul.f32 %v699_v12, %v278_v32 }
  0x14   : > { %436 = vmatpush1.bf16.msra.mxu0 %v757_v8  ;;  %732 = vmatpush1.bf16.msra.mxu1 %v757_v8  ;;  %v305_v26 = vadd.f32 %v700_v19, %v290_v20  ;;  %v306_v27 = vadd.f32 %v700_v19, %v291_v21  ;;  %v303_v43 = vadd.f32 %v700_v19, %v288_v35 }
  0x15   : > { %437 = vmatprep.subr.bf16.mxu0 %v758_v9  ;;  %725 = vmatprep.subr.bf16.mxu1 %v758_v9  ;;  %v309_v34 = vmax.f32 %v301_v24, 0.0  ;;  %v310_v38 = vmax.f32 %v302_v25, 0.0  ;;  %v304_v44 = vadd.f32 %v700_v19, %v289_v36  ;;  %v307_v47 = vadd.f32 %v700_v19, %v292_v37 }
  0x16   : > { %v313_v39 = vmax.f32 %v305_v26, 0.0  ;;  %v314_v40 = vmax.f32 %v306_v27, 0.0  ;;  %v308_v48 = vadd.f32 %v700_v19, %v293_v41  ;;  %v311_v49 = vmax.f32 %v303_v43, 0.0 }
  0x17   : > { %v317_v45 = vpack.c.bf16 %v310_v38, %v309_v34  ;;  %v312_v50 = vmax.f32 %v304_v44, 0.0  ;;  %v315_v51 = vmax.f32 %v307_v47, 0.0 }
  0x18   : > { %438 = vmatpush1.bf16.msra.mxu0 %v760_v10  ;;  %733 = vmatpush1.bf16.msra.mxu1 %v760_v10  ;;  %v319_v46 = vpack.c.bf16 %v314_v40, %v313_v39  ;;  %v316_v52 = vmax.f32 %v308_v48, 0.0 }
  0x19   : > { %439 = vmatprep.subr.bf16.mxu0 %v761_v16  ;;  %726 = vmatprep.subr.bf16.mxu1 %v761_v16  ;;  %v318_v53 = vpack.c.bf16 %v312_v50, %v311_v49 }
  0x1a   : > { %v320_v54 = vpack.c.bf16 %v316_v52, %v315_v51 }
  0x1c   : > { %440 = vmatpush1.bf16.msra.mxu0 %v763_v22  ;;  %734 = vmatpush1.bf16.msra.mxu1 %v763_v22 }
  0x1d   : > { %441 = vmatprep.subr.bf16.mxu0 %v764_v23  ;;  %727 = vmatprep.subr.bf16.mxu1 %v764_v23 }
  0x20   : > { %442 = vmatpush1.bf16.msra.mxu0 %v766_v31  ;;  %735 = vmatpush1.bf16.msra.mxu1 %v766_v31 }
  0x21   : > { %443 = vmatprep.subr.bf16.mxu0 %v767_v33  ;;  %728 = vmatprep.subr.bf16.mxu1 %v767_v33 }
  0x24   : > { %444 = vmatpush1.bf16.msra.mxu0 %v769_v42  ;;  %736 = vmatpush1.bf16.msra.mxu1 %v769_v42 }
  0x27   : > { %462 = vmatmul.mubr.bf16.vlgmr.msra.gmra.mrb[0].mxu0 %v317_v45  ;;  %482 = vmatmul.mubr.bf16.vlgmr.msra.gmra.mrb[0].mxu1 %v319_v46 }
  0x28   : > { %471 = vmatprep.mubr.bf16.mxu0 %v778_v2  ;;  %491 = vmatprep.mubr.bf16.mxu1 %v778_v2 }
  0x2f   : > { %472 = vmatmul.mubr.bf16.gmra.mrb[4].mxu0 %v318_v53  ;;  %492 = vmatmul.mubr.bf16.gmra.mrb[4].mxu1 %v320_v54 }
  0xfa   : > { %v463_v62 = vpop.f32.mrb[0].mxu0  ;;  %v483_v63 = vpop.f32.mrb[0].mxu1 }
  0xfb   : > { %v464_v0 = vadd.f32 %v463_v62, %v342_v60  ;;  %v465_v1 = vpop.f32.mrb[1].mxu0  ;;  %v484_v2 = vadd.f32 %v483_v63, %v342_v60  ;;  %v485_v3 = vpop.f32.mrb[1].mxu1 }
  0xfc   : > { %v466_v4 = vadd.f32 %v465_v1, %v907_v61  ;;  %v467_v5 = vpop.f32.mrb[2].mxu0  ;;  %v486_v6 = vadd.f32 %v485_v3, %v907_v61  ;;  %v487_v7 = vpop.f32.mrb[2].mxu1 }
  0xfd   : > { %580 = vst [vmem:[%s912_s27] sm:$0xff] %v464_v0  ;;  %v468_v8 = vadd.f32 %v467_v5, %v342_v60  ;;  %v469_v9 = vpop.f32.mrb[3].mxu0  ;;  %588 = vst [vmem:[%s912_s27 + $0x40] sm:$0xff] %v484_v2  ;;  %v488_v10 = vadd.f32 %v487_v7, %v342_v60  ;;  %v489_v11 = vpop.f32.mrb[3].mxu1  ;;  %v528_v14 = vmul.f32 %v464_v0, %v464_v0 }
  0xfe   : > { %581 = vst [vmem:[%s912_s27 + $0x8] sm:$0xff] %v466_v4  ;;  %v470_v12 = vadd.f32 %v469_v9, %v907_v61  ;;  %589 = vst [vmem:[%s912_s27 + $0x48] sm:$0xff] %v486_v6  ;;  %v490_v13 = vadd.f32 %v489_v11, %v907_v61  ;;  %v529_v17 = vmul.f32 %v466_v4, %v466_v4 }
  0xff   : > { %v502_v15 = vadd.f32 %v468_v8, %v464_v0  ;;  %v530_v16 = vmul.f32 %v468_v8, %v468_v8  ;;  %582 = vst [vmem:[%s912_s27 + $0x10] sm:$0xff] %v468_v8  ;;  %590 = vst [vmem:[%s912_s27 + $0x50] sm:$0xff] %v488_v10  ;;  %v536_v48 = vmul.f32 %v484_v2, %v484_v2 }
 0x100   : > { %v515_v18 = vadd.f32 %v470_v12, %v466_v4  ;;  %v531_v19 = vmul.f32 %v470_v12, %v470_v12  ;;  %583 = vst [vmem:[%s912_s27 + $0x18] sm:$0xff] %v470_v12  ;;  %591 = vst [vmem:[%s912_s27 + $0x58] sm:$0xff] %v490_v13  ;;  %v537_v51 = vmul.f32 %v486_v6, %v486_v6 }
 0x101   : > { %v544_v20 = vadd.f32 %v530_v16, %v528_v14  ;;  %v538_v54 = vmul.f32 %v488_v10, %v488_v10  ;;  %v539_v59 = vmul.f32 %v490_v13, %v490_v13 }
 0x102   : > { %v557_v21 = vadd.f32 %v531_v19, %v529_v17  ;;  %v473_v22 = vpop.f32.mrb[4].mxu0  ;;  %v493_v23 = vpop.f32.mrb[4].mxu1 }
 0x103   : > { %v474_v24 = vadd.f32 %v473_v22, %v342_v60  ;;  %v475_v25 = vpop.f32.mrb[5].mxu0  ;;  %v494_v26 = vadd.f32 %v493_v23, %v342_v60  ;;  %v495_v27 = vpop.f32.mrb[5].mxu1 }
 0x104   : > { %v476_v28 = vadd.f32 %v475_v25, %v907_v61  ;;  %v477_v29 = vpop.f32.mrb[6].mxu0  ;;  %v496_v30 = vadd.f32 %v495_v27, %v907_v61  ;;  %v497_v31 = vpop.f32.mrb[6].mxu1 }
 0x105   : > { %v503_v32 = vadd.f32 %v502_v15, %v474_v24  ;;  %v532_v33 = vmul.f32 %v474_v24, %v474_v24  ;;  %584 = vst [vmem:[%s912_s27 + $0x20] sm:$0xff] %v474_v24  ;;  %v478_v34 = vadd.f32 %v477_v29, %v342_v60  ;;  %v479_v35 = vpop.f32.mrb[7].mxu0  ;;  %592 = vst [vmem:[%s912_s27 + $0x60] sm:$0xff] %v494_v26  ;;  %v499_v36 = vpop.f32.mrb[7].mxu1 }
 0x106   : > { %v516_v37 = vadd.f32 %v515_v18, %v476_v28  ;;  %v533_v38 = vmul.f32 %v476_v28, %v476_v28  ;;  %585 = vst [vmem:[%s912_s27 + $0x28] sm:$0xff] %v476_v28  ;;  %v480_v39 = vadd.f32 %v479_v35, %v907_v61  ;;  %593 = vst [vmem:[%s912_s27 + $0x68] sm:$0xff] %v496_v30 }
 0x107   : > { %v545_v40 = vadd.f32 %v544_v20, %v532_v33  ;;  %v504_v41 = vadd.f32 %v503_v32, %v478_v34  ;;  %v534_v42 = vmul.f32 %v478_v34, %v478_v34  ;;  %586 = vst [vmem:[%s912_s27 + $0x30] sm:$0xff] %v478_v34  ;;  %v498_v43 = vadd.f32 %v497_v31, %v342_v60 }
 0x108   : > { %v558_v44 = vadd.f32 %v557_v21, %v533_v38  ;;  %v517_v45 = vadd.f32 %v516_v37, %v480_v39  ;;  %v535_v46 = vmul.f32 %v480_v39, %v480_v39  ;;  %587 = vst [vmem:[%s912_s27 + $0x38] sm:$0xff] %v480_v39  ;;  %v500_v47 = vadd.f32 %v499_v36, %v907_v61 }
 0x109   : > { %v505_v49 = vadd.f32 %v504_v41, %v484_v2  ;;  %v546_v50 = vadd.f32 %v545_v40, %v534_v42  ;;  %594 = vst [vmem:[%s912_s27 + $0x70] sm:$0xff] %v498_v43  ;;  %v540_v58 = vmul.f32 %v494_v26, %v494_v26  ;;  %v541_v63 = vmul.f32 %v496_v30, %v496_v30 }
 0x10a   : > { %v518_v52 = vadd.f32 %v517_v45, %v486_v6  ;;  %v559_v53 = vadd.f32 %v558_v44, %v535_v46  ;;  %595 = vst [vmem:[%s912_s27 + $0x78] sm:$0xff] %v500_v47  ;;  %v542_v5 = vmul.f32 %v498_v43, %v498_v43  ;;  %v543_v8 = vmul.f32 %v500_v47, %v500_v47 }
 0x10b   : > { %v547_v55 = vadd.f32 %v546_v50, %v536_v48  ;;  %v506_v57 = vadd.f32 %v505_v49, %v488_v10 }
 0x10c   : > { %v560_v60 = vadd.f32 %v559_v53, %v537_v51  ;;  %v519_v62 = vadd.f32 %v518_v52, %v490_v13 }
 0x10d   : > { %v507_v0 = vadd.f32 %v506_v57, %v494_v26  ;;  %v548_v1 = vadd.f32 %v547_v55, %v538_v54 }
 0x10e   : > { %v520_v61 = vadd.f32 %v519_v62, %v496_v30  ;;  %v561_v3 = vadd.f32 %v560_v60, %v539_v59 }
 0x10f   : > { %v549_v2 = vadd.f32 %v548_v1, %v540_v58  ;;  %v508_v4 = vadd.f32 %v507_v0, %v498_v43 }
 0x110   : > { %v562_v7 = vadd.f32 %v561_v3, %v541_v63  ;;  %v521_v6 = vadd.f32 %v520_v61, %v500_v47 }
 0x111   : > { %v509_v9 = vrot.slane %v508_v4, 4  ;;  %v550_v11 = vadd.f32 %v549_v2, %v542_v5 }
 0x112   : > { %v522_v10 = vrot.slane %v521_v6, 4  ;;  %v563_v12 = vadd.f32 %v562_v7, %v543_v8 }
 0x113   : > { %v510_v14 = vadd.f32 %v509_v9, %v508_v4  ;;  %v551_v13 = vrot.slane %v550_v11, 4 }
 0x114   : > { %v523_v15 = vadd.f32 %v522_v10, %v521_v6  ;;  %v564_v16 = vrot.slane %v563_v12, 4 }
 0x115   : > { %v511_v17 = vrot.slane %v510_v14, 2  ;;  %v552_v18 = vadd.f32 %v551_v13, %v550_v11 }
 0x116   : > { %v524_v19 = vrot.slane %v523_v15, 2  ;;  %v565_v20 = vadd.f32 %v564_v16, %v563_v12 }
 0x117   : > { %v512_v21 = vadd.f32 %v511_v17, %v510_v14  ;;  %v553_v22 = vrot.slane %v552_v18, 2 }
 0x118   : > { %v525_v23 = vadd.f32 %v524_v19, %v523_v15  ;;  %v566_v24 = vrot.slane %v565_v20, 2 }
 0x119   : > { %v554_v25 = vadd.f32 %v553_v22, %v552_v18  ;;  %v513_v26 = vrot.slane %v512_v21, 1 }
 0x11a   : > { %v567_v27 = vadd.f32 %v566_v24, %v565_v20  ;;  %v526_v29 = vrot.slane %v525_v23, 1 }
 0x11b   : > { %v555_v28 = vrot.slane %v554_v25, 1  ;;  %v514_v32 = vadd.f32 %v513_v26, %v512_v21 }
 0x11c   : > { %v568_v30 = vrot.slane %v567_v27, 1  ;;  %v527_v35 = vadd.f32 %v526_v29, %v525_v23 }
 0x11d   : > { %v556_v31 = vadd.f32 %v555_v28, %v554_v25 }
 0x11e   : > { %v569_v33 = vadd.f32 %v568_v30, %v567_v27 }
 0x11f   : > { %v574_v34 = vsel %vm573_vm0, %v556_v31, 0.0 }
 0x120   : > { %v576_v36 = vsel %vm572_vm1, %v514_v32, %v574_v34  ;;  %v575_v37 = vsel %vm573_vm0, %v569_v33, 0.0 }
 0x121   : > { %578 = vst [vmem:[%s269_s30] sm:$0xff] %v576_v36  ;;  %v577_v38 = vsel %vm572_vm1, %v527_v35, %v575_v37 }
 0x122   : > { %579 = vst [vmem:[%s269_s30 + $0x8] sm:$0xff] %v577_v38 }
 0x123 PF: > { %s17_s21 = sadd.s32 1, %s776_s21  }
 0x124   : > { %p14_p5 = scmp.ge.s32.totalorder %s17_s21, 4  }
 0x126   :  { %16 = sbr.rel (!%p14_p5) target bundleno = 1 (0x1), region = 82 }

// kernel: generator_forward.3
= control target key start
LH: loop header
LB: loop body
LE: loop exit
PB: predicated region body
PF: predicated region fallthrough
CT: control target
= control target key end

     0   :  { %12 = vsyncpa [#allocation3], 0  ;;  %s1519_s0 = inlined_call_operand.vmem [shape: f32[32,256], index: 0, kind: input, shape index: {}]   ;;  %s1520_s1 = inlined_call_operand.vmem [shape: f32[1,256], index: 1, kind: input, shape index: {}]   ;;  %s1521_s2 = inlined_call_operand.vmem [shape: f32[1,256], index: 2, kind: input, shape index: {}]   ;;  %s1522_s3 = inlined_call_operand.hbm [shape: bf16[256,512], index: 3, kind: input, shape index: {}]   ;;  %s1523_s4 = inlined_call_operand.hbm [shape: f32[1,512], index: 4, kind: input, shape index: {}]   ;;  %s1524_s5 = inlined_call_operand.vmem [shape: f32[32,512], index: 5, kind: output, shape index: {0}]   ;;  %s1525_s6 = inlined_call_operand.vmem [shape: f32[16,512], index: 6, kind: output, shape index: {1}]  }
   0x1   :  { %13 = vsyncpa [#allocation5], 0  ;;  %s1360_s21 = smov 0  }
   0x2 LB: > { %s1366_s22 = sadd.s32 4294967295, %s1319_s21   ;;  %p1038_p0 = scmp.ge.s32.totalorder %s1319_s21, 1  ;;  %s1319_s21 = sphi %s1360_s21, %s19_s21  }
   0x3   : > { %p186_p1 = scmp.lt.s32.totalorder %s1319_s21, 3  ;;  %s1321_s23 = smov [#allocation2]  }
   0x4   : > { %s204_s24 = sshll.u32 %s1321_s23, 4  ;;  %p1526_p3 = scmp.eq.s32.totalorder %s1366_s22, 0  ;;  %s205_s24 = int_to_ptr.vmem [resolvable:$true] %s204_s24 }
   0x5   : > { %p1370_p2 = pnand %p1038_p0, %p186_p1  ;;  %s1322_s26 = smov [#allocation4]  }
   0x6   : > { %s218_s27 = sshll.u32 %s1322_s26, 4  ;;  %s1249_s7 = scalar_lea.hbm %s1522_s3, 8192  ;;  %s1383_s27 = int_to_ptr.vmem [resolvable:$true] %s218_s27 }
   0x7   : > { %s1528_s25 = scalar_select %p1370_p2, 1, 0 }
   0x8   : > { %p1130_p4 = pneg %p1370_p2  ;;  %p1250_p6 = scmp.ne.s32.totalorder %s1522_s3, %s1249_s7 }
   0x9   : > { %p1256_p10 = scmp.lt.u32.totalorder %s1249_s7, %s1522_s3 }
   0xa   : > { %p1379_p5 = pnand %p1526_p3, %p1130_p4 }
   0xc   : > { %p1251_p7 = pneg %p1379_p5 }
   0xe   : > { %p1252_p8 = pnand %p1251_p7, %p1250_p6 }
  0x10   : > { %p1253_p9 = pneg %p1252_p8 }
  0x12   : > { %p1258_p11 = pnand %p1256_p10, %p1253_p9 }
  0x14   : > { %1261 = shalt.err (!%p1258_p11)
}
  0x15   : > { %s1262_s12 = scalar_lea.vmem %s205_s24, 8192  ;;  %p1270_p1 = scmp.lt.s32.totalorder %s205_s24, %s205_s24 }
  0x16   : > { %p1263_p12 = scmp.ne.s32.totalorder %s205_s24, %s1262_s12  ;;  %p1271_p4 = scmp.lt.s32.totalorder %s1262_s12, %s1262_s12 }
  0x18   : > { %p1265_p13 = pnand %p1263_p12, %p1251_p7  ;;  %p1272_p3 = por %p1271_p4, %p1270_p1 }
  0x1a   : > { %p1266_p0 = pneg %p1265_p13 }
  0x1c   : > { %p1273_p2 = pnand %p1272_p3, %p1266_p0 }
  0x1e   : > { %1276 = shalt.err (!%p1273_p2)
}
  0x1f   : > { %s1323_s13 = smov 256   ;;  %s1324_s14 = smov 16  }
  0x20   : > { %1133 = dma.hbm_to_vmem [thread:$0]  (!%p1379_p5), %s1522_s3, 8192, %s205_s24, [#allocation3], %s1323_s13, %s1323_s13, %s1324_s14  }
  0x21   : > { %s1277_s19 = scalar_lea.hbm %s1523_s4, 64 }
  0x22   : > { %p1278_p6 = scmp.ne.s32.totalorder %s1523_s4, %s1277_s19  ;;  %p1284_p8 = scmp.lt.u32.totalorder %s1277_s19, %s1523_s4 }
  0x24   : > { %p1280_p2 = pnand %p1278_p6, %p1251_p7 }
  0x26   : > { %p1281_p3 = pneg %p1280_p2 }
  0x28   : > { %p1286_p9 = pnand %p1284_p8, %p1281_p3 }
  0x2a   : > { %1289 = shalt.err (!%p1286_p9)
}
  0x2b   : > { %s1290_s24 = scalar_lea.vmem %s1383_s27, 64  ;;  %p1298_p13 = scmp.lt.s32.totalorder %s1383_s27, %s1383_s27 }
  0x2c   : > { %p1291_p10 = scmp.ne.s32.totalorder %s1383_s27, %s1290_s24  ;;  %p1299_p0 = scmp.lt.s32.totalorder %s1290_s24, %s1290_s24 }
  0x2e   : > { %p1293_p11 = pnand %p1291_p10, %p1251_p7  ;;  %p1300_p1 = por %p1299_p0, %p1298_p13 }
  0x30   : > { %p1294_p12 = pneg %p1293_p11 }
  0x32   : > { %p1301_p4 = pnand %p1300_p1, %p1294_p12 }
  0x34   : > { %1304 = shalt.err (!%p1301_p4)
}
  0x35   : > { %1136 = dma.hbm_to_vmem [thread:$0]  (!%p1379_p5), %s1523_s4, 64, %s1383_s27, [#allocation5]  }
  0x36   : > { %p1530_p6 = scmp.ne.s32.totalorder %s1528_s25, 0 }
  0x37   : > { %p1531_p2 = scmp.eq.s32.totalorder (!%p1530_p6), %s1366_s22, 0 }
  0x38   : > { %241 = sbr.rel (%p1530_p6) target bundleno = 369 (0x171), region = 40 }
  0x3f   : > { %1310 = dma.done.wait (%p1531_p2), [#allocation3], 8192   ;;  %p1532_p7 = pmov %p1531_p2 }
  0x40   : > { %p1533_p3 = pmov %p1531_p2 }
  0x41   : > { %1312 = vsyncadd (%p1532_p7), [#allocation3], 4294959104 }
  0x42   : > { %1314 = dma.done.wait (%p1533_p3), [#allocation5], 64   ;;  %p1534_p8 = pmov %p1531_p2 }
  0x43   : > { %v1153_v0 = vld [vmem:[#allocation2 + $0x4] ss:$16 sps:$4 sm:$0xff]   ;;  %v1155_v1 = vld [vmem:[#allocation2 + $0xc] ss:$16 sps:$4 sm:$0xff]   ;;  %v1157_v2 = vld [vmem:[#allocation2] ss:$16 sps:$4 sm:$0xff]   ;;  %v307_v36 = vlaneseq }
  0x44   : > { %1316 = vsyncadd (%p1534_p8), [#allocation5], 4294967232  ;;  %749 = vmatprep.subr.bf16.mxu0 %v1153_v0  ;;  %v1158_v3 = vld [vmem:[#allocation2 + $0x8] ss:$16 sps:$4 sm:$0xff]   ;;  %792 = vmatprep.subr.bf16.mxu1 %v1155_v1  ;;  %v1159_v4 = vld [vmem:[#allocation2 + $0x24] ss:$16 sps:$4 sm:$0xff]  }
  0x45   : > { %750 = vmatpush1.bf16.msra.mxu0 %v1157_v2  ;;  %793 = vmatpush1.bf16.msra.mxu1 %v1158_v3  ;;  %v1161_v5 = vld [vmem:[#allocation2 + $0x2c] ss:$16 sps:$4 sm:$0xff]   ;;  %v1163_v6 = vld [vmem:[#allocation2 + $0x20] ss:$16 sps:$4 sm:$0xff]   ;;  %v1164_v7 = vld [vmem:[#allocation2 + $0x28] ss:$16 sps:$4 sm:$0xff]  }
  0x46   : > { %751 = vmatprep.subr.bf16.mxu0 %v1159_v4  ;;  %794 = vmatprep.subr.bf16.mxu1 %v1161_v5  ;;  %v1165_v8 = vld [vmem:[#allocation2 + $0x44] ss:$16 sps:$4 sm:$0xff]   ;;  %v1167_v9 = vld [vmem:[#allocation2 + $0x4c] ss:$16 sps:$4 sm:$0xff]   ;;  %v1169_v10 = vld [vmem:[#allocation2 + $0x40] ss:$16 sps:$4 sm:$0xff]  }
  0x47   : > { %v1170_v11 = vld [vmem:[#allocation2 + $0x48] ss:$16 sps:$4 sm:$0xff]   ;;  %v1171_v12 = vld [vmem:[#allocation2 + $0x64] ss:$16 sps:$4 sm:$0xff]   ;;  %v1173_v13 = vld [vmem:[#allocation2 + $0x6c] ss:$16 sps:$4 sm:$0xff]  }
  0x48   : > { %v1175_v14 = vld [vmem:[#allocation2 + $0x60] ss:$16 sps:$4 sm:$0xff]   ;;  %v1176_v15 = vld [vmem:[#allocation2 + $0x68] ss:$16 sps:$4 sm:$0xff]   ;;  %v1177_v16 = vld [vmem:[#allocation2 + $0x84] ss:$16 sps:$4 sm:$0xff]  }
  0x49   : > { %752 = vmatpush1.bf16.msra.mxu0 %v1163_v6  ;;  %795 = vmatpush1.bf16.msra.mxu1 %v1164_v7  ;;  %v1179_v17 = vld [vmem:[#allocation2 + $0x8c] ss:$16 sps:$4 sm:$0xff]   ;;  %v1181_v18 = vld [vmem:[#allocation2 + $0x80] ss:$16 sps:$4 sm:$0xff]   ;;  %v1182_v19 = vld [vmem:[#allocation2 + $0x88] ss:$16 sps:$4 sm:$0xff]  }
  0x4a   : > { %753 = vmatprep.subr.bf16.mxu0 %v1165_v8  ;;  %796 = vmatprep.subr.bf16.mxu1 %v1167_v9  ;;  %v1183_v20 = vld [vmem:[#allocation2 + $0xa4] ss:$16 sps:$4 sm:$0xff]   ;;  %v1185_v21 = vld [vmem:[#allocation2 + $0xac] ss:$16 sps:$4 sm:$0xff]   ;;  %v1187_v22 = vld [vmem:[#allocation2 + $0xa0] ss:$16 sps:$4 sm:$0xff]  }
  0x4b   : > { %v1188_v23 = vld [vmem:[#allocation2 + $0xa8] ss:$16 sps:$4 sm:$0xff]   ;;  %v1189_v24 = vld [vmem:[#allocation2 + $0xc4] ss:$16 sps:$4 sm:$0xff]   ;;  %v1191_v25 = vld [vmem:[#allocation2 + $0xcc] ss:$16 sps:$4 sm:$0xff]  }
  0x4c   : > { %v1193_v26 = vld [vmem:[#allocation2 + $0xc0] ss:$16 sps:$4 sm:$0xff]   ;;  %v1194_v27 = vld [vmem:[#allocation2 + $0xc8] ss:$16 sps:$4 sm:$0xff]   ;;  %v1195_v28 = vld [vmem:[#allocation2 + $0xe4] ss:$16 sps:$4 sm:$0xff]  }
  0x4d   : > { %754 = vmatpush1.bf16.msra.mxu0 %v1169_v10  ;;  %797 = vmatpush1.bf16.msra.mxu1 %v1170_v11  ;;  %v1197_v29 = vld [vmem:[#allocation2 + $0xec] ss:$16 sps:$4 sm:$0xff]   ;;  %s1045_s25 = sshll.u32 %s1366_s22, 1  ;;  %v1199_v30 = vld [vmem:[#allocation2 + $0xe0] ss:$16 sps:$4 sm:$0xff]   ;;  %v1445_v40 = vshrl.u32 %v307_v36, 7 }
  0x4e   : > { %755 = vmatprep.subr.bf16.mxu0 %v1171_v12  ;;  %798 = vmatprep.subr.bf16.mxu1 %v1173_v13  ;;  %v1200_v31 = vld [vmem:[#allocation2 + $0xe8] ss:$16 sps:$4 sm:$0xff]   ;;  %v1201_v32 = vld [vmem:[#allocation2 + $0x104] ss:$16 sps:$4 sm:$0xff]   ;;  %p283_p5 = scmp.lt.s32.totalorder %s1045_s25, 3  ;;  %p296_p9 = scmp.lt.s32.totalorder %s1366_s22, 1 }
  0x4f   : > { %v1203_v33 = vld [vmem:[#allocation2 + $0x10c] ss:$16 sps:$4 sm:$0xff]   ;;  %v1205_v34 = vld [vmem:[#allocation2 + $0x100] ss:$16 sps:$4 sm:$0xff]   ;;  %v1206_v35 = vld [vmem:[#allocation2 + $0x108] ss:$16 sps:$4 sm:$0xff]  }
  0x50   : > { %v1207_v37 = vld [vmem:[#allocation2 + $0x124] ss:$16 sps:$4 sm:$0xff]   ;;  %s1536_s25 = smov (!%p283_p5, %s1045_s25), 3  ;;  %v1209_v38 = vld [vmem:[#allocation2 + $0x12c] ss:$16 sps:$4 sm:$0xff]   ;;  %v1454_v47 = vsub.s32 1, %v1445_v40 }
  0x51   : > { %756 = vmatpush1.bf16.msra.mxu0 %v1175_v14  ;;  %799 = vmatpush1.bf16.msra.mxu1 %v1176_v15  ;;  %v1211_v39 = vld [vmem:[#allocation2 + $0x120] ss:$16 sps:$4 sm:$0xff]   ;;  %v1212_v41 = vld [vmem:[#allocation2 + $0x128] ss:$16 sps:$4 sm:$0xff]   ;;  %v1213_v42 = vld [vmem:[#allocation2 + $0x144] ss:$16 sps:$4 sm:$0xff]  }
  0x52   : > { %757 = vmatprep.subr.bf16.mxu0 %v1177_v16  ;;  %800 = vmatprep.subr.bf16.mxu1 %v1179_v17  ;;  %s1119_s27 = sshll.u32 %s1536_s25, 4  ;;  %v1215_v43 = vld [vmem:[#allocation2 + $0x14c] ss:$16 sps:$4 sm:$0xff]   ;;  %v1217_v44 = vld [vmem:[#allocation2 + $0x140] ss:$16 sps:$4 sm:$0xff]   ;;  %v1462_v52 = vsub.s32 0, %v1445_v40 }
  0x53   : > { %v1218_v45 = vld [vmem:[#allocation2 + $0x148] ss:$16 sps:$4 sm:$0xff]   ;;  %s1451_s9 = scalar_lea.vmem %s1519_s0, %s1119_s27  ;;  %v1219_v46 = vld [vmem:[#allocation2 + $0x164] ss:$16 sps:$4 sm:$0xff]   ;;  %v1221_v48 = vld [vmem:[#allocation2 + $0x16c] ss:$16 sps:$4 sm:$0xff]  }
  0x54   : > { %v302_v49 = vld [vmem:[%s1451_s9 + $0x8] sm:$0xff]  ;;  %v304_v50 = vld [vmem:[%s1451_s9 + $0x18] sm:$0xff]  ;;  %v305_v51 = vld [vmem:[%s1520_s1] sm:$0x3]  ;;  %s1120_s14 = sshll.u32 %s1536_s25, 5  ;;  %s1538_s22 = smov (!%p296_p9, %s1366_s22), 1 }
  0x55   : > { %758 = vmatpush1.bf16.msra.mxu0 %v1181_v18  ;;  %801 = vmatpush1.bf16.msra.mxu1 %v1182_v19  ;;  %v321_v53 = vld [vmem:[%s1521_s2] sm:$0x3]  ;;  %v1224_v55 = vld [vmem:[#allocation2 + $0x168] ss:$16 sps:$4 sm:$0xff]   ;;  %v314_v56 = vrot.slane %v305_v51, %v1454_v47  ;;  %v1225_v57 = vld [vmem:[#allocation2 + $0x184] ss:$16 sps:$4 sm:$0xff]   ;;  %v310_v63 = vrot.slane %v305_v51, %v1462_v52  ;;  %s1481_s17 = scalar_lea.vmem %s1524_s5, %s1120_s14 }
  0x56   : > { %759 = vmatprep.subr.bf16.mxu0 %v1183_v20  ;;  %802 = vmatprep.subr.bf16.mxu1 %v1185_v21  ;;  %v1223_v54 = vld [vmem:[#allocation2 + $0x160] ss:$16 sps:$4 sm:$0xff]   ;;  %v1227_v58 = vld [vmem:[#allocation2 + $0x18c] ss:$16 sps:$4 sm:$0xff]   ;;  %v330_v59 = vrot.slane %v321_v53, %v1454_v47  ;;  %v1230_v0 = vld [vmem:[#allocation2 + $0x188] ss:$16 sps:$4 sm:$0xff]   ;;  %v326_v9 = vrot.slane %v321_v53, %v1462_v52 }
  0x57   : > { %v318_v60 = vmul.f32 %v314_v56, %v302_v49  ;;  %v320_v61 = vmul.f32 %v314_v56, %v304_v50  ;;  %v1229_v62 = vld [vmem:[#allocation2 + $0x180] ss:$16 sps:$4 sm:$0xff]   ;;  %v1231_v5 = vld [vmem:[#allocation2 + $0x1a4] ss:$16 sps:$4 sm:$0xff]   ;;  %v1233_v6 = vld [vmem:[#allocation2 + $0x1ac] ss:$16 sps:$4 sm:$0xff]  }
  0x58   : > { %v301_v3 = vld [vmem:[%s1451_s9] sm:$0xff]  ;;  %v303_v4 = vld [vmem:[%s1451_s9 + $0x10] sm:$0xff]  ;;  %v1236_v13 = vld [vmem:[#allocation2 + $0x1a8] ss:$16 sps:$4 sm:$0xff]   ;;  %s1121_s18 = sshll.u32 %s1538_s22, 5  ;;  %vm902_vm0 = vcmp.eq.s32.totalorder %v1445_v40, 1 }
  0x59   : > { %760 = vmatpush1.bf16.msra.mxu0 %v1187_v22  ;;  %803 = vmatpush1.bf16.msra.mxu1 %v1188_v23  ;;  %v334_v1 = vadd.f32 %v330_v59, %v318_v60  ;;  %v336_v2 = vadd.f32 %v330_v59, %v320_v61  ;;  %v317_v10 = vmul.f32 %v310_v63, %v301_v3  ;;  %v1235_v12 = vld [vmem:[#allocation2 + $0x1a0] ss:$16 sps:$4 sm:$0xff]   ;;  %v1237_v15 = vld [vmem:[#allocation2 + $0x1c4] ss:$16 sps:$4 sm:$0xff]   ;;  %v1239_v16 = vld [vmem:[#allocation2 + $0x1cc] ss:$16 sps:$4 sm:$0xff]   ;;  %s300_s23 = scalar_lea.vmem %s1525_s6, %s1121_s18 }
  0x5a   : > { %761 = vmatprep.subr.bf16.mxu0 %v1189_v24  ;;  %804 = vmatprep.subr.bf16.mxu1 %v1191_v25  ;;  %v319_v11 = vmul.f32 %v310_v63, %v303_v4  ;;  %v1241_v19 = vld [vmem:[#allocation2 + $0x1c0] ss:$16 sps:$4 sm:$0xff]   ;;  %v1242_v20 = vld [vmem:[#allocation2 + $0x1c8] ss:$16 sps:$4 sm:$0xff]   ;;  %v1243_v21 = vld [vmem:[#allocation2 + $0x1e4] ss:$16 sps:$4 sm:$0xff]  }
  0x5b   : > { %v338_v7 = vmax.f32 %v334_v1, 0.0  ;;  %v340_v8 = vmax.f32 %v336_v2, 0.0  ;;  %v333_v17 = vadd.f32 %v326_v9, %v317_v10  ;;  %v1245_v22 = vld [vmem:[#allocation2 + $0x1ec] ss:$16 sps:$4 sm:$0xff]   ;;  %v1247_v25 = vld [vmem:[#allocation2 + $0x1e0] ss:$16 sps:$4 sm:$0xff]  }
  0x5c   : > { %v335_v18 = vadd.f32 %v326_v9, %v319_v11  ;;  %vm901_vm1 = vcmp.eq.s32.totalorder %v1445_v40, 0 }
  0x5d   : > { %762 = vmatpush1.bf16.msra.mxu0 %v1193_v26  ;;  %805 = vmatpush1.bf16.msra.mxu1 %v1194_v27  ;;  %v342_v14 = vpack.c.bf16 %v340_v8, %v338_v7  ;;  %v337_v23 = vmax.f32 %v333_v17, 0.0  ;;  %v1248_v26 = vld [vmem:[#allocation2 + $0x1e8] ss:$16 sps:$4 sm:$0xff]  }
  0x5e   : > { %763 = vmatprep.subr.bf16.mxu0 %v1195_v28  ;;  %806 = vmatprep.subr.bf16.mxu1 %v1197_v29  ;;  %v339_v24 = vmax.f32 %v335_v18, 0.0  ;;  %v419_v28 = vsub.s32 2, %v1445_v40  ;;  %v407_v29 = vld [vmem:[#allocation4] sm:$0xf] }
  0x5f   : > { %781 = vmatprep.mubr.bf16.mxu0 %v342_v14  ;;  %824 = vmatprep.mubr.bf16.mxu1 %v342_v14 }
  0x60   : > { %v341_v27 = vpack.c.bf16 %v339_v24, %v337_v23 }
  0x61   : > { %764 = vmatpush1.bf16.msra.mxu0 %v1199_v30  ;;  %807 = vmatpush1.bf16.msra.mxu1 %v1200_v31  ;;  %v423_v30 = vsub.s32 3, %v1445_v40  ;;  %v412_v31 = vrot.slane %v407_v29, %v1462_v52 }
  0x62   : > { %765 = vmatprep.subr.bf16.mxu0 %v1201_v32  ;;  %808 = vmatprep.subr.bf16.mxu1 %v1203_v33  ;;  %v420_v32 = vrot.slane %v407_v29, %v419_v28  ;;  %v416_v33 = vrot.slane %v407_v29, %v1454_v47 }
  0x65   : > { %766 = vmatpush1.bf16.msra.mxu0 %v1205_v34  ;;  %809 = vmatpush1.bf16.msra.mxu1 %v1206_v35  ;;  %v424_v34 = vrot.slane %v407_v29, %v423_v30 }
  0x66   : > { %767 = vmatprep.subr.bf16.mxu0 %v1207_v37  ;;  %810 = vmatprep.subr.bf16.mxu1 %v1209_v38 }
  0x69   : > { %768 = vmatpush1.bf16.msra.mxu0 %v1211_v39  ;;  %811 = vmatpush1.bf16.msra.mxu1 %v1212_v41 }
  0x6a   : > { %769 = vmatprep.subr.bf16.mxu0 %v1213_v42  ;;  %812 = vmatprep.subr.bf16.mxu1 %v1215_v43 }
  0x6d   : > { %770 = vmatpush1.bf16.msra.mxu0 %v1217_v44  ;;  %813 = vmatpush1.bf16.msra.mxu1 %v1218_v45 }
  0x6e   : > { %771 = vmatprep.subr.bf16.mxu0 %v1219_v46  ;;  %814 = vmatprep.subr.bf16.mxu1 %v1221_v48 }
  0x71   : > { %772 = vmatpush1.bf16.msra.mxu0 %v1223_v54  ;;  %815 = vmatpush1.bf16.msra.mxu1 %v1224_v55 }
  0x72   : > { %773 = vmatprep.subr.bf16.mxu0 %v1225_v57  ;;  %816 = vmatprep.subr.bf16.mxu1 %v1227_v58 }
  0x75   : > { %774 = vmatpush1.bf16.msra.mxu0 %v1229_v62  ;;  %817 = vmatpush1.bf16.msra.mxu1 %v1230_v0 }
  0x76   : > { %775 = vmatprep.subr.bf16.mxu0 %v1231_v5  ;;  %818 = vmatprep.subr.bf16.mxu1 %v1233_v6 }
  0x79   : > { %776 = vmatpush1.bf16.msra.mxu0 %v1235_v12  ;;  %819 = vmatpush1.bf16.msra.mxu1 %v1236_v13 }
  0x7a   : > { %777 = vmatprep.subr.bf16.mxu0 %v1237_v15  ;;  %820 = vmatprep.subr.bf16.mxu1 %v1239_v16 }
  0x7d   : > { %778 = vmatpush1.bf16.msra.mxu0 %v1241_v19  ;;  %821 = vmatpush1.bf16.msra.mxu1 %v1242_v20 }
  0x7e   : > { %779 = vmatprep.subr.bf16.mxu0 %v1243_v21  ;;  %822 = vmatprep.subr.bf16.mxu1 %v1245_v22 }
  0x81   : > { %780 = vmatpush1.bf16.msra.mxu0 %v1247_v25  ;;  %823 = vmatpush1.bf16.msra.mxu1 %v1248_v26 }
  0x84   : > { %782 = vmatmul.mubr.bf16.vlgmr.msra.gmra.mrb[0].mxu0 %v341_v27  ;;  %825 = vmatmul.mubr.bf16.vlgmr.msra.gmra.mrb[0].mxu1 %v341_v27 }
 0x157   : > { %v783_v35 = vpop.f32.mrb[0].mxu0  ;;  %v826_v36 = vpop.f32.mrb[0].mxu1 }
 0x158   : > { %v784_v37 = vadd.f32 %v783_v35, %v412_v31  ;;  %v827_v38 = vadd.f32 %v826_v36, %v420_v32  ;;  %v785_v39 = vpop.f32.mrb[1].mxu0  ;;  %v828_v41 = vpop.f32.mrb[1].mxu1 }
 0x159   : > { %v786_v42 = vadd.f32 %v785_v39, %v416_v33  ;;  %v829_v43 = vadd.f32 %v828_v41, %v424_v34  ;;  %v787_v44 = vpop.f32.mrb[2].mxu0  ;;  %v830_v45 = vpop.f32.mrb[2].mxu1 }
 0x15a   : > { %v863_v46 = vmul.f32 %v784_v37, %v784_v37  ;;  %915 = vst [vmem:[%s1481_s17] sm:$0xff] %v784_v37  ;;  %v865_v47 = vmul.f32 %v827_v38, %v827_v38  ;;  %917 = vst [vmem:[%s1481_s17 + $0x10] sm:$0xff] %v827_v38  ;;  %v788_v48 = vadd.f32 %v787_v44, %v412_v31  ;;  %v789_v50 = vpop.f32.mrb[3].mxu0  ;;  %v832_v51 = vpop.f32.mrb[3].mxu1 }
 0x15b   : > { %v831_v49 = vadd.f32 %v830_v45, %v420_v32  ;;  %v864_v52 = vmul.f32 %v786_v42, %v786_v42  ;;  %916 = vst [vmem:[%s1481_s17 + $0x8] sm:$0xff] %v786_v42  ;;  %v866_v53 = vmul.f32 %v829_v43, %v829_v43  ;;  %918 = vst [vmem:[%s1481_s17 + $0x18] sm:$0xff] %v829_v43 }
 0x15c   : > { %v790_v54 = vadd.f32 %v789_v50, %v416_v33  ;;  %v833_v55 = vadd.f32 %v832_v51, %v424_v34  ;;  %v835_v56 = vadd.f32 %v788_v48, %v784_v37  ;;  %v867_v57 = vmul.f32 %v788_v48, %v788_v48  ;;  %919 = vst [vmem:[%s1481_s17 + $0x20] sm:$0xff] %v788_v48 }
 0x15d   : > { %v849_v58 = vadd.f32 %v831_v49, %v827_v38  ;;  %v869_v59 = vmul.f32 %v831_v49, %v831_v49  ;;  %921 = vst [vmem:[%s1481_s17 + $0x30] sm:$0xff] %v831_v49 }
 0x15e   : > { %v842_v60 = vadd.f32 %v790_v54, %v786_v42  ;;  %v868_v61 = vmul.f32 %v790_v54, %v790_v54  ;;  %920 = vst [vmem:[%s1481_s17 + $0x28] sm:$0xff] %v790_v54  ;;  %v856_v62 = vadd.f32 %v833_v55, %v829_v43  ;;  %v870_v63 = vmul.f32 %v833_v55, %v833_v55 }
 0x15f   : > { %922 = vst [vmem:[%s1481_s17 + $0x38] sm:$0xff] %v833_v55  ;;  %v836_v0 = vrot.slane %v835_v56, 4  ;;  %v871_v1 = vadd.f32 %v867_v57, %v863_v46  ;;  %v850_v2 = vrot.slane %v849_v58, 4  ;;  %v885_v3 = vadd.f32 %v869_v59, %v865_v47 }
 0x160   : > { %v843_v4 = vrot.slane %v842_v60, 4  ;;  %v878_v5 = vadd.f32 %v868_v61, %v864_v52  ;;  %v857_v6 = vrot.slane %v856_v62, 4  ;;  %v892_v7 = vadd.f32 %v870_v63, %v866_v53 }
 0x161   : > { %v837_v8 = vadd.f32 %v836_v0, %v835_v56  ;;  %v872_v9 = vrot.slane %v871_v1, 4  ;;  %v851_v10 = vadd.f32 %v850_v2, %v849_v58  ;;  %v886_v11 = vrot.slane %v885_v3, 4 }
 0x162   : > { %v844_v12 = vadd.f32 %v843_v4, %v842_v60  ;;  %v879_v13 = vrot.slane %v878_v5, 4  ;;  %v858_v14 = vadd.f32 %v857_v6, %v856_v62  ;;  %v893_v15 = vrot.slane %v892_v7, 4 }
 0x163   : > { %v838_v16 = vrot.slane %v837_v8, 2  ;;  %v873_v17 = vadd.f32 %v872_v9, %v871_v1  ;;  %v852_v18 = vrot.slane %v851_v10, 2  ;;  %v887_v19 = vadd.f32 %v886_v11, %v885_v3 }
 0x164   : > { %v845_v20 = vrot.slane %v844_v12, 2  ;;  %v880_v21 = vadd.f32 %v879_v13, %v878_v5  ;;  %v859_v22 = vrot.slane %v858_v14, 2  ;;  %v894_v23 = vadd.f32 %v893_v15, %v892_v7 }
 0x165   : > { %v839_v24 = vadd.f32 %v838_v16, %v837_v8  ;;  %v874_v25 = vrot.slane %v873_v17, 2  ;;  %v853_v26 = vadd.f32 %v852_v18, %v851_v10  ;;  %v888_v27 = vrot.slane %v887_v19, 2 }
 0x166   : > { %v846_v28 = vadd.f32 %v845_v20, %v844_v12  ;;  %v881_v29 = vrot.slane %v880_v21, 2  ;;  %v860_v30 = vadd.f32 %v859_v22, %v858_v14  ;;  %v895_v31 = vrot.slane %v894_v23, 2 }
 0x167   : > { %v875_v32 = vadd.f32 %v874_v25, %v873_v17  ;;  %v889_v33 = vadd.f32 %v888_v27, %v887_v19  ;;  %v840_v34 = vrot.slane %v839_v24, 1  ;;  %v854_v35 = vrot.slane %v853_v26, 1 }
 0x168   : > { %v882_v36 = vadd.f32 %v881_v29, %v880_v21  ;;  %v896_v37 = vadd.f32 %v895_v31, %v894_v23  ;;  %v847_v41 = vrot.slane %v846_v28, 1  ;;  %v861_v42 = vrot.slane %v860_v30, 1 }
 0x169   : > { %v876_v38 = vrot.slane %v875_v32, 1  ;;  %v890_v39 = vrot.slane %v889_v33, 1  ;;  %v841_v47 = vadd.f32 %v840_v34, %v839_v24  ;;  %v855_v48 = vadd.f32 %v854_v35, %v853_v26 }
 0x16a   : > { %v883_v43 = vrot.slane %v882_v36, 1  ;;  %v897_v44 = vrot.slane %v896_v37, 1  ;;  %v848_v53 = vadd.f32 %v847_v41, %v846_v28  ;;  %v862_v54 = vadd.f32 %v861_v42, %v860_v30 }
 0x16b   : > { %v877_v45 = vadd.f32 %v876_v38, %v875_v32  ;;  %v891_v46 = vadd.f32 %v890_v39, %v889_v33 }
 0x16c   : > { %v884_v49 = vadd.f32 %v883_v43, %v882_v36  ;;  %v898_v50 = vadd.f32 %v897_v44, %v896_v37 }
 0x16d   : > { %v903_v51 = vsel %vm902_vm0, %v877_v45, 0.0  ;;  %v905_v52 = vsel %vm902_vm0, %v891_v46, 0.0 }
 0x16e   : > { %v907_v55 = vsel %vm901_vm1, %v841_v47, %v903_v51  ;;  %v909_v56 = vsel %vm901_vm1, %v855_v48, %v905_v52  ;;  %v904_v57 = vsel %vm902_vm0, %v884_v49, 0.0  ;;  %v906_v58 = vsel %vm902_vm0, %v898_v50, 0.0 }
 0x16f   : > { %911 = vst [vmem:[%s300_s23] sm:$0xff] %v907_v55  ;;  %913 = vst [vmem:[%s300_s23 + $0x10] sm:$0xff] %v909_v56  ;;  %v908_v59 = vsel %vm901_vm1, %v848_v53, %v904_v57  ;;  %v910_v60 = vsel %vm901_vm1, %v862_v54, %v906_v58 }
 0x170   : > { %912 = vst [vmem:[%s300_s23 + $0x8] sm:$0xff] %v908_v59  ;;  %914 = vst [vmem:[%s300_s23 + $0x18] sm:$0xff] %v910_v60 }
 0x171 PF: > { %s19_s21 = sadd.s32 1, %s1319_s21  }
 0x172   : > { %p16_p10 = scmp.ge.s32.totalorder %s19_s21, 4  }
 0x174   :  { %18 = sbr.rel (!%p16_p10) target bundleno = 2 (0x2), region = 91 }
 0x17b   :  { %963 = vsyncpa [#allocation3], 1 }
 0x17c   :  { %965 = vsyncpa [#allocation3 + $0x1], 1 }
 0x17d   :  { %966 = vsyncpa [#allocation5], 1 }

// kernel: generator_forward.5
= control target key start
LH: loop header
LB: loop body
LE: loop exit
PB: predicated region body
PF: predicated region fallthrough
CT: control target
= control target key end

     0   :  { %s764_s18 = smov 0   ;;  %s900_s0 = inlined_call_operand.vmem [shape: f32[128,256], index: 0, kind: input, shape index: {}]   ;;  %s901_s1 = inlined_call_operand.vmem [shape: f32[1,256], index: 1, kind: input, shape index: {}]   ;;  %s902_s2 = inlined_call_operand.vmem [shape: f32[1,256], index: 2, kind: input, shape index: {}]   ;;  %s903_s3 = inlined_call_operand.vmem [shape: bf16[256,128], index: 3, kind: input, shape index: {}]   ;;  %s904_s4 = inlined_call_operand.vmem [shape: f32[1,128], index: 4, kind: input, shape index: {}]   ;;  %s905_s5 = inlined_call_operand.vmem [shape: f32[128,128], index: 5, kind: output, shape index: {}]  }
   0x1 LB: > { %s600_s19 = sadd.s32 4294967295, %s732_s18   ;;  %p604_p0 = scmp.ge.s32.totalorder %s732_s18, 1  ;;  %s732_s18 = sphi %s764_s18, %s15_s18  }
   0x2   : > { %p189_p1 = scmp.lt.s32.totalorder %s732_s18, 3 }
   0x4   : > { %p190_p2 = pnand %p604_p0, %p189_p1 }
   0x5   : > { %v694_v0 = vld [vmem:[%s903_s3 + $0x40] sm:$0xff] (!%p190_p2)   ;;  %s605_s22 = sshll.u32 (!%p190_p2), %s600_s19, 3  ;;  %v696_v2 = vld [vmem:[%s903_s3 + $0x48] sm:$0xff] (!%p190_p2)   ;;  %v698_v4 = vld [vmem:[%s903_s3 + $0x50] sm:$0xff] (!%p190_p2)   ;;  %v250_v5 = vlaneseq (!%p190_p2) }
   0x6   : > { %193 = sbr.rel (%p190_p2) target bundleno = 278 (0x116), region = 40  ;;  %v695_v1 = vld [vmem:[%s903_s3] sm:$0xff] (!%p190_p2)   ;;  %630 = vmatprep.subr.bf16.mxu0 (!%p190_p2), %v694_v0  ;;  %670 = vmatprep.subr.bf16.mxu1 (!%p190_p2), %v694_v0  ;;  %p219_p3 = scmp.lt.s32.totalorder (!%p190_p2), %s605_s22, 15  ;;  %v697_v3 = vld [vmem:[%s903_s3 + $0x8] sm:$0xff] (!%p190_p2)   ;;  %v699_v6 = vld [vmem:[%s903_s3 + $0x10] sm:$0xff] (!%p190_p2)  }
   0x7   : > { %631 = vmatpush3.bf16.msra.mxu0 (!%p190_p2), %v695_v1  ;;  %678 = vmatpush3.bf16.msra.mxu1 (!%p190_p2), %v695_v1  ;;  %v700_v7 = vld [vmem:[%s903_s3 + $0x58] sm:$0xff] (!%p190_p2)   ;;  %v251_v8 = vshrl.u32 (!%p190_p2), %v250_v5, 7  ;;  %v702_v10 = vld [vmem:[%s903_s3 + $0x60] sm:$0xff] (!%p190_p2)   ;;  %v704_v14 = vld [vmem:[%s903_s3 + $0x68] sm:$0xff] (!%p190_p2)  }
   0x8   : > { %632 = vmatprep.subr.bf16.mxu0 (!%p190_p2), %v696_v2  ;;  %671 = vmatprep.subr.bf16.mxu1 (!%p190_p2), %v696_v2  ;;  %v701_v9 = vld [vmem:[%s903_s3 + $0x18] sm:$0xff] (!%p190_p2)   ;;  %v703_v13 = vld [vmem:[%s903_s3 + $0x20] sm:$0xff] (!%p190_p2)   ;;  %v705_v28 = vld [vmem:[%s903_s3 + $0x28] sm:$0xff] (!%p190_p2)  }
   0x9   : > { %v252_v11 = vsub.s32 (!%p190_p2), 0, %v251_v8  ;;  %v256_v12 = vsub.s32 (!%p190_p2), 1, %v251_v8  ;;  %v248_v17 = vld [vmem:[%s901_s1] sm:$0x3] (!%p190_p2)  ;;  %v706_v33 = vld [vmem:[%s903_s3 + $0x70] sm:$0xff] (!%p190_p2)   ;;  %v708_v53 = vld [vmem:[%s903_s3 + $0x78] sm:$0xff] (!%p190_p2)  }
   0xa   : > { %v276_v20 = vld [vmem:[%s902_s2] sm:$0x3] (!%p190_p2)  ;;  %v707_v47 = vld [vmem:[%s903_s3 + $0x30] sm:$0xff] (!%p190_p2)   ;;  %v709_v5 = vld [vmem:[%s903_s3 + $0x38] sm:$0xff] (!%p190_p2)  }
   0xb   : > { %633 = vmatpush3.bf16.msra.mxu0 (!%p190_p2), %v697_v3  ;;  %679 = vmatpush3.bf16.msra.mxu1 (!%p190_p2), %v697_v3  ;;  %v818_v18 = vrot.slane (!%p190_p2), %v248_v17, %v252_v11  ;;  %v820_v19 = vrot.slane (!%p190_p2), %v248_v17, %v256_v12  ;;  %v827_v23 = vrot.slane (!%p190_p2), %v276_v20, %v252_v11 }
   0xc   : > { %634 = vmatprep.subr.bf16.mxu0 (!%p190_p2), %v698_v4  ;;  %672 = vmatprep.subr.bf16.mxu1 (!%p190_p2), %v698_v4  ;;  %v829_v24 = vrot.slane (!%p190_p2), %v276_v20, %v256_v12 }
   0xd   : > { %s907_s22 = smov (!%p219_p3, %s605_s22), 15 }
   0xe   : > { %s629_s10 = sshll.u32 %s907_s22, 4  ;;  %s609_s15 = sshll.u32 %s907_s22, 3 }
   0xf   : > { %635 = vmatpush3.bf16.msra.mxu0 %v699_v6  ;;  %680 = vmatpush3.bf16.msra.mxu1 %v699_v6  ;;  %s805_s17 = scalar_lea.vmem %s900_s0, %s629_s10  ;;  %s229_s19 = scalar_lea.vmem %s905_s5, %s609_s15 }
  0x10   : > { %636 = vmatprep.subr.bf16.mxu0 %v700_v7  ;;  %673 = vmatprep.subr.bf16.mxu1 %v700_v7  ;;  %v233_v15 = vld [vmem:[%s805_s17 + $0x8] sm:$0xff]  ;;  %v235_v16 = vld [vmem:[%s805_s17 + $0x18] sm:$0xff]  ;;  %v232_v25 = vld [vmem:[%s805_s17] sm:$0xff] }
  0x11   : > { %v241_v21 = vld [vmem:[%s805_s17 + $0x48] sm:$0xff]  ;;  %v243_v22 = vld [vmem:[%s805_s17 + $0x58] sm:$0xff]  ;;  %v234_v26 = vld [vmem:[%s805_s17 + $0x10] sm:$0xff]  ;;  %v261_v29 = vmul.f32 %v820_v19, %v233_v15  ;;  %v263_v30 = vmul.f32 %v820_v19, %v235_v16  ;;  %v260_v35 = vmul.f32 %v818_v18, %v232_v25 }
  0x12   : > { %v240_v27 = vld [vmem:[%s805_s17 + $0x40] sm:$0xff]  ;;  %v269_v31 = vmul.f32 %v820_v19, %v241_v21  ;;  %v242_v32 = vld [vmem:[%s805_s17 + $0x50] sm:$0xff]  ;;  %v271_v34 = vmul.f32 %v820_v19, %v243_v22  ;;  %v262_v36 = vmul.f32 %v818_v18, %v234_v26  ;;  %v237_v45 = vld [vmem:[%s805_s17 + $0x28] sm:$0xff] }
  0x13   : > { %637 = vmatpush3.bf16.msra.mxu0 %v701_v9  ;;  %681 = vmatpush3.bf16.msra.mxu1 %v701_v9  ;;  %v289_v37 = vadd.f32 %v829_v24, %v261_v29  ;;  %v291_v38 = vadd.f32 %v829_v24, %v263_v30  ;;  %v268_v40 = vmul.f32 %v818_v18, %v240_v27  ;;  %v239_v46 = vld [vmem:[%s805_s17 + $0x38] sm:$0xff]  ;;  %v245_v52 = vld [vmem:[%s805_s17 + $0x68] sm:$0xff]  ;;  %v236_v63 = vld [vmem:[%s805_s17 + $0x20] sm:$0xff] }
  0x14   : > { %638 = vmatprep.subr.bf16.mxu0 %v702_v10  ;;  %674 = vmatprep.subr.bf16.mxu1 %v702_v10  ;;  %v297_v39 = vadd.f32 %v829_v24, %v269_v31  ;;  %v299_v41 = vadd.f32 %v829_v24, %v271_v34  ;;  %v288_v42 = vadd.f32 %v827_v23, %v260_v35  ;;  %v247_v58 = vld [vmem:[%s805_s17 + $0x78] sm:$0xff]  ;;  %v238_v4 = vld [vmem:[%s805_s17 + $0x30] sm:$0xff]  ;;  %v244_v9 = vld [vmem:[%s805_s17 + $0x60] sm:$0xff] }
  0x15   : > { %v290_v43 = vadd.f32 %v827_v23, %v262_v36  ;;  %v270_v44 = vmul.f32 %v818_v18, %v242_v32  ;;  %v305_v48 = vmax.f32 %v289_v37, 0.0  ;;  %v307_v49 = vmax.f32 %v291_v38, 0.0  ;;  %v246_v10 = vld [vmem:[%s805_s17 + $0x70] sm:$0xff]  ;;  %v610_v37 = vld [vmem:[%s904_s4] ss:$0 sm:$0xff] }
  0x16   : > { %v313_v50 = vmax.f32 %v297_v39, 0.0  ;;  %v296_v51 = vadd.f32 %v827_v23, %v268_v40  ;;  %v315_v54 = vmax.f32 %v299_v41, 0.0  ;;  %v304_v55 = vmax.f32 %v288_v42, 0.0 }
  0x17   : > { %639 = vmatpush3.bf16.msra.mxu0 %v703_v13  ;;  %682 = vmatpush3.bf16.msra.mxu1 %v703_v13  ;;  %v306_v56 = vmax.f32 %v290_v43, 0.0  ;;  %v298_v57 = vadd.f32 %v827_v23, %v270_v44  ;;  %v321_v59 = vpack.c.bf16 %v307_v49, %v305_v48  ;;  %v265_v61 = vmul.f32 %v820_v19, %v237_v45 }
  0x18   : > { %640 = vmatprep.subr.bf16.mxu0 %v704_v14  ;;  %675 = vmatprep.subr.bf16.mxu1 %v704_v14  ;;  %v312_v60 = vmax.f32 %v296_v51, 0.0  ;;  %v267_v62 = vmul.f32 %v820_v19, %v239_v46  ;;  %v325_v0 = vpack.c.bf16 %v315_v54, %v313_v50  ;;  %v273_v3 = vmul.f32 %v820_v19, %v245_v52 }
  0x19   : > { %v320_v1 = vpack.c.bf16 %v306_v56, %v304_v55  ;;  %v314_v2 = vmax.f32 %v298_v57, 0.0  ;;  %v293_v6 = vadd.f32 %v829_v24, %v265_v61  ;;  %v275_v8 = vmul.f32 %v820_v19, %v247_v58  ;;  %495 = vmatprep.mubr.bf16.mxu0 %v321_v59 }
  0x1a   : > { %v295_v7 = vadd.f32 %v829_v24, %v267_v62  ;;  %v301_v12 = vadd.f32 %v829_v24, %v273_v3  ;;  %v264_v13 = vmul.f32 %v818_v18, %v236_v63  ;;  %511 = vmatprep.mubr.bf16.mxu1 %v325_v0  ;;  %v266_v17 = vmul.f32 %v818_v18, %v238_v4 }
  0x1b   : > { %641 = vmatpush3.bf16.msra.mxu0 %v705_v28  ;;  %683 = vmatpush3.bf16.msra.mxu1 %v705_v28  ;;  %v324_v11 = vpack.c.bf16 %v314_v2, %v312_v60  ;;  %v309_v14 = vmax.f32 %v293_v6, 0.0  ;;  %v303_v16 = vadd.f32 %v829_v24, %v275_v8  ;;  %v272_v21 = vmul.f32 %v818_v18, %v244_v9 }
  0x1c   : > { %642 = vmatprep.subr.bf16.mxu0 %v706_v33  ;;  %676 = vmatprep.subr.bf16.mxu1 %v706_v33  ;;  %v311_v15 = vmax.f32 %v295_v7, 0.0  ;;  %v317_v20 = vmax.f32 %v301_v12, 0.0  ;;  %v292_v19 = vadd.f32 %v827_v23, %v264_v13  ;;  %v274_v22 = vmul.f32 %v818_v18, %v246_v10 }
  0x1d   : > { %v319_v26 = vmax.f32 %v303_v16, 0.0  ;;  %v294_v27 = vadd.f32 %v827_v23, %v266_v17  ;;  %v300_v28 = vadd.f32 %v827_v23, %v272_v21 }
  0x1e   : > { %v323_v25 = vpack.c.bf16 %v311_v15, %v309_v14  ;;  %v302_v29 = vadd.f32 %v827_v23, %v274_v22  ;;  %v308_v30 = vmax.f32 %v292_v19, 0.0 }
  0x1f   : > { %643 = vmatpush3.bf16.msra.mxu0 %v707_v47  ;;  %684 = vmatpush3.bf16.msra.mxu1 %v707_v47  ;;  %v327_v24 = vpack.c.bf16 %v319_v26, %v317_v20  ;;  %v310_v31 = vmax.f32 %v294_v27, 0.0  ;;  %v316_v32 = vmax.f32 %v300_v28, 0.0 }
  0x20   : > { %644 = vmatprep.subr.bf16.mxu0 %v708_v53  ;;  %677 = vmatprep.subr.bf16.mxu1 %v708_v53  ;;  %v318_v33 = vmax.f32 %v302_v29, 0.0 }
  0x21   : > { %v322_v18 = vpack.c.bf16 %v310_v31, %v308_v30 }
  0x22   : > { %v326_v34 = vpack.c.bf16 %v318_v33, %v316_v32 }
  0x23   : > { %645 = vmatpush3.bf16.msra.mxu0 %v709_v5  ;;  %685 = vmatpush3.bf16.msra.mxu1 %v709_v5 }
  0x26   : > { %496 = vmatmul.mubr.bf16.vlgmr.msra.gmra.mrb[0].mxu0 %v320_v1  ;;  %512 = vmatmul.mubr.bf16.vlgmr.msra.gmra.mrb[0].mxu1 %v324_v11 }
  0x27   : > { %503 = vmatprep.mubr.bf16.mxu0 %v323_v25  ;;  %519 = vmatprep.mubr.bf16.mxu1 %v327_v24 }
  0x2e   : > { %504 = vmatmul.mubr.bf16.gmra.mrb[4].mxu0 %v322_v18  ;;  %520 = vmatmul.mubr.bf16.gmra.mrb[4].mxu1 %v326_v34 }
  0xf9   : > { %v646_v35 = vpop.f32.mrb[0].mxu0  ;;  %v658_v36 = vpop.f32.mrb[0].mxu1 }
  0xfa   : > { %v647_v23 = vpop.f32.mrb[1].mxu0  ;;  %v659_v38 = vpop.f32.mrb[1].mxu1 }
  0xfb   : > { %v648_v39 = vadd.f32 %v647_v23, %v646_v35  ;;  %v660_v40 = vadd.f32 %v659_v38, %v658_v36  ;;  %v649_v41 = vpop.f32.mrb[2].mxu0  ;;  %v661_v42 = vpop.f32.mrb[2].mxu1 }
  0xfc   : > { %v650_v43 = vpop.f32.mrb[3].mxu0  ;;  %v662_v44 = vpop.f32.mrb[3].mxu1 }
  0xfd   : > { %v498_v45 = vadd.f32 %v648_v39, %v610_v37  ;;  %v514_v46 = vadd.f32 %v660_v40, %v610_v37  ;;  %v651_v47 = vadd.f32 %v650_v43, %v649_v41  ;;  %v663_v48 = vadd.f32 %v662_v44, %v661_v42 }
  0xff   : > { %710 = vtanh.f32 %v498_v45  ;;  %v501_v49 = vadd.f32 %v651_v47, %v610_v37  ;;  %v517_v50 = vadd.f32 %v663_v48, %v610_v37 }
 0x100   : > { %712 = vtanh.f32 %v514_v46 }
 0x101   : > { %714 = vtanh.f32 %v501_v49  ;;  %v652_v51 = vpop.f32.mrb[4].mxu0  ;;  %v664_v52 = vpop.f32.mrb[4].mxu1 }
 0x102   : > { %716 = vtanh.f32 %v517_v50  ;;  %v653_v53 = vpop.f32.mrb[5].mxu0  ;;  %v665_v54 = vpop.f32.mrb[5].mxu1 }
 0x103   : > { %v654_v55 = vadd.f32 %v653_v53, %v652_v51  ;;  %v666_v56 = vadd.f32 %v665_v54, %v664_v52  ;;  %v655_v57 = vpop.f32.mrb[6].mxu0  ;;  %v667_v58 = vpop.f32.mrb[6].mxu1 }
 0x104   : > { %v656_v59 = vpop.f32.mrb[7].mxu0  ;;  %v668_v60 = vpop.f32.mrb[7].mxu1 }
 0x105   : > { %v506_v61 = vadd.f32 %v654_v55, %v610_v37  ;;  %v522_v62 = vadd.f32 %v666_v56, %v610_v37  ;;  %v657_v63 = vadd.f32 %v656_v59, %v655_v57  ;;  %v669_v0 = vadd.f32 %v668_v60, %v667_v58 }
 0x107   : > { %718 = vtanh.f32 %v506_v61  ;;  %v509_v1 = vadd.f32 %v657_v63, %v610_v37  ;;  %v525_v2 = vadd.f32 %v669_v0, %v610_v37 }
 0x108   : > { %720 = vtanh.f32 %v522_v62 }
 0x109   : > { %v711_v3 = vpop.eup %710  ;;  %722 = vtanh.f32 %v509_v1 }
 0x10a   : > { %v713_v4 = vpop.eup %712  ;;  %536 = vst [vmem:[%s229_s19] sm:$0xff] %v711_v3  ;;  %724 = vtanh.f32 %v525_v2 }
 0x10b   : > { %v715_v5 = vpop.eup %714  ;;  %540 = vst [vmem:[%s229_s19 + $0x20] sm:$0xff] %v713_v4 }
 0x10c   : > { %v717_v6 = vpop.eup %716  ;;  %537 = vst [vmem:[%s229_s19 + $0x8] sm:$0xff] %v715_v5 }
 0x10d   : > { %541 = vst [vmem:[%s229_s19 + $0x28] sm:$0xff] %v717_v6 }
 0x111   : > { %v719_v7 = vpop.eup %718 }
 0x112   : > { %v721_v8 = vpop.eup %720  ;;  %538 = vst [vmem:[%s229_s19 + $0x10] sm:$0xff] %v719_v7 }
 0x113   : > { %v723_v9 = vpop.eup %722  ;;  %542 = vst [vmem:[%s229_s19 + $0x30] sm:$0xff] %v721_v8 }
 0x114   : > { %v725_v10 = vpop.eup %724  ;;  %539 = vst [vmem:[%s229_s19 + $0x18] sm:$0xff] %v723_v9 }
 0x115   : > { %543 = vst [vmem:[%s229_s19 + $0x38] sm:$0xff] %v725_v10 }
 0x116 PF: > { %s15_s18 = sadd.s32 1, %s732_s18  }
 0x117   : > { %p12_p4 = scmp.ge.s32.totalorder %s15_s18, 4  }
 0x119   :  { %14 = sbr.rel (!%p12_p4) target bundleno = 1 (0x1), region = 70 }

</bundles_post_ra>
